<compile_context>
chip_gen: v7x
topology: tpu7x:2x2x1
jax: 0.10.0
libtpu: 0.0.40
codegen_flags: <defaults>
</compile_context>

<pallas_src>
import functools

import jax
import jax.numpy as jnp
from jax import lax
from jax.experimental import pallas as pl
from jax.experimental.pallas import tpu as pltpu

# Model hyper-parameters (MLPDecoder.__init__)
N_IN_NODE = 4      # n_in_node (D)
EDGE_TYPES = 2     # edge_types (K)
MSG_HID = 32       # msg_hid   (H)
MSG_OUT = 32       # msg_out   (M)
N_HID = 32         # n_hid
DO_PROB = 0.0      # dropout prob == 0.0 -> F.dropout is the identity
SKIP_FIRST = False # skip_first

# Max (batch, time) slices per grid step.  Bounds the O(TBc^2) aggregation
# matrix: TBc^2 * N * E * 4 bytes = 1.6 MiB at TBc=64, N=5, E=20.
TBC_MAX = 64


def _round_up(x, m):
    return ((x + m - 1) // m) * m


def _slab_layout():
    """Row layout of the packed weight/bias slab (all blocks LW lanes wide)."""
    D, K, H, M, NH = N_IN_NODE, EDGE_TYPES, MSG_HID, MSG_OUT, N_HID
    lw = _round_up(max(K * H, K * M, NH, 2 * D, D), 64)
    return dict(
        lanes=lw,
        w1=0 * lw,     # [2D, K*H]   msg_fc1, fused over K (pre = [recv | send])
        w2=1 * lw,     # [K*H, K*M]  msg_fc2, block-diagonal over K
        wo1a=2 * lw,   # [D, NH]     out_fc1 (node half)
        wo1b=3 * lw,   # [K*M, NH]   out_fc1 (message half), stacked K times
        wo2=4 * lw,    # [NH, NH]
        wo3=5 * lw,    # [NH, D]
        bias=6 * lw,   # rows: b1, b2, bo1, bo2, bo3
        rows=6 * lw + 8,
    )


_LAYOUT = _slab_layout()


def mlp_decoder_kernel(x_ref, pre_ref, rtx_ref, agg_ref, slab_ref, out_ref):
    """One grid step = TBc (batch, time) slices; every operand is LW lanes wide."""
    f32 = jnp.float32
    lay = _LAYOUT
    lw = lay["lanes"]

    x = x_ref[0]           # [TBc*N, LW]  node states (cols 0:D real, rest 0)
    pre = pre_ref[0]       # [TBc*E, LW]  [receivers | senders] (cols 0:2D real)
    rtx = rtx_ref[0]       # [TBc*E, LW]  rel_type expanded over K*M lanes

    def blk(off):          # static slice of the packed weight slab (no DMA)
        return slab_ref[off:off + lw, :]

    w1, w2 = blk(lay["w1"]), blk(lay["w2"])
    wo1a, wo1b = blk(lay["wo1a"]), blk(lay["wo1b"])
    wo2, wo3 = blk(lay["wo2"]), blk(lay["wo3"])
    b = lay["bias"]
    b1 = slab_ref[b + 0:b + 1, :]
    b2 = slab_ref[b + 1:b + 2, :]
    bo1 = slab_ref[b + 2:b + 3, :]
    bo2 = slab_ref[b + 3:b + 4, :]
    bo3 = slab_ref[b + 4:b + 5, :]

    def dot(a, w):
        return jnp.dot(a, w, preferred_element_type=f32)

    # Message MLP fused over all K edge types (dropout p=0.0 dropped).
    h = jnp.maximum(dot(pre, w1) + b1, 0.0)       # [TBc*E, LW] (cols 0:K*H real)
    m = jnp.maximum(dot(h, w2) + b2, 0.0)         # [TBc*E, LW] (cols 0:K*M real)

    # rel_type weighting: one full-width VPU multiply (skip_first folded into rtx).
    weighted = m * rtx

    # Per-receiver aggregation for all slices: block-diagonal kron(I, rel_rec^T).
    agg = dot(agg_ref[...], weighted)             # [TBc*N, LW]

    # Output MLP + residual.  wo1b is out_fc1's message half stacked K times, so
    # this matmul also performs the sum over edge types.
    h1 = jnp.maximum(dot(x, wo1a) + dot(agg, wo1b) + bo1, 0.0)
    h2 = jnp.maximum(dot(h1, wo2) + bo2, 0.0)
    pred = dot(h2, wo3) + bo3                     # [TBc*N, LW] (cols D: are 0)

    out_ref[0] = x + pred


def _pack_params(params):
    """Pack all weights/biases into one [rows, LW] f32 slab (pure layout work)."""
    D, K, H, M, NH = N_IN_NODE, EDGE_TYPES, MSG_HID, MSG_OUT, N_HID
    lay = _LAYOUT
    slab = jnp.zeros((lay["rows"], lay["lanes"]), jnp.float32)

    w1cat = jnp.transpose(params["w1"], (1, 0, 2)).reshape(2 * D, K * H)
    slab = slab.at[lay["w1"]:lay["w1"] + 2 * D, :K * H].set(w1cat)

    w2bd = jnp.zeros((K * H, K * M), jnp.float32)
    for k in range(K):
        w2bd = w2bd.at[k * H:(k + 1) * H, k * M:(k + 1) * M].set(params["w2"][k])
    slab = slab.at[lay["w2"]:lay["w2"] + K * H, :K * M].set(w2bd)

    slab = slab.at[lay["wo1a"]:lay["wo1a"] + D, :NH].set(params["wo1"][:D])
    wo1b_stacked = jnp.tile(params["wo1"][D:], (K, 1))            # [K*M, NH]
    slab = slab.at[lay["wo1b"]:lay["wo1b"] + K * M, :NH].set(wo1b_stacked)
    slab = slab.at[lay["wo2"]:lay["wo2"] + NH, :NH].set(params["wo2"])
    slab = slab.at[lay["wo3"]:lay["wo3"] + NH, :D].set(params["wo3"])

    b = lay["bias"]
    slab = slab.at[b + 0, :K * H].set(params["b1"].reshape(-1))
    slab = slab.at[b + 1, :K * M].set(params["b2"].reshape(-1))
    slab = slab.at[b + 2, :NH].set(params["bo1"].reshape(-1))
    slab = slab.at[b + 3, :NH].set(params["bo2"].reshape(-1))
    slab = slab.at[b + 4, :D].set(params["bo3"].reshape(-1))
    return slab


def _choose_tile(bt):
    """Largest divisor of bt that is <= TBC_MAX (bt itself for small inputs)."""
    t = min(bt, TBC_MAX)
    while bt % t:
        t -= 1
    return t


def _single_step(x, rt, rel_rec, rel_send, slab):
    """single_step_forward for all (batch, time) slices: x [B,Ts,N,D] -> [B,Ts,N,D]."""
    B, Ts, N, D = x.shape
    E = rel_rec.shape[0]
    K = rt.shape[-1]
    M = MSG_OUT
    lay = _LAYOUT
    lw = lay["lanes"]

    BT = B * Ts
    TBc = _choose_tile(BT)
    # G == 1 for small B*T: extra grid steps on single-TC chips (v5e/v6e) only
    # add ~0.35us each and shrink matmul rows.  TODO(synk): on v7x evaluate a
    # 2-way split with CORE_PARALLEL / pl.core_map to shard across both TCs.
    G = BT // TBc

    hp = lax.Precision.HIGHEST
    xb = x.reshape(BT, N, D)

    # One-hot gathers hoisted out of the kernel (exact, no MXU truncation).
    recv = jnp.einsum("en,bnd->bed", rel_rec, xb, precision=hp)
    send = jnp.einsum("en,bnd->bed", rel_send, xb, precision=hp)
    pre = jnp.concatenate([recv, send], axis=-1)                   # [BT, E, 2D]
    pre = jnp.pad(pre, ((0, 0), (0, 0), (0, lw - 2 * D)))
    pre = pre.reshape(G, TBc * E, lw)

    # rel_type expanded to one M-wide lane block per edge type; edge types
    # skipped by skip_first are zeroed here so the kernel needs no branch.
    rtf = rt.reshape(BT, E, K)
    start_idx = 1 if SKIP_FIRST else 0
    if start_idx:
        rtf = rtf.at[..., :start_idx].set(0.0)
    rtx = jnp.repeat(rtf, M, axis=-1)                              # [BT, E, K*M]
    rtx = jnp.pad(rtx, ((0, 0), (0, 0), (0, lw - K * M)))
    rtx = rtx.reshape(G, TBc * E, lw)

    # Node states padded to LW lanes so the residual add / output store are
    # lane-dense (the wrapper slices the first D lanes back out).
    xp = jnp.pad(xb, ((0, 0), (0, 0), (0, lw - D))).reshape(G, TBc * N, lw)

    # Block-diagonal per-slice aggregation matrix (grid-invariant; O(TBc^2) but
    # bounded by TBC_MAX).
    eye = jnp.eye(TBc, dtype=jnp.float32)
    agg_mat = jnp.kron(eye, rel_rec.T)                             # [TBc*N, TBc*E]

    out = pl.pallas_call(
        mlp_decoder_kernel,
        out_shape=jax.ShapeDtypeStruct((G, TBc * N, lw), jnp.float32),
        grid=(G,),
        in_specs=[
            pl.BlockSpec((1, TBc * N, lw), lambda g: (g, 0, 0)),
            pl.BlockSpec((1, TBc * E, lw), lambda g: (g, 0, 0)),
            pl.BlockSpec((1, TBc * E, lw), lambda g: (g, 0, 0)),
            # Grid-invariant operands.  TODO(synk): pipeline_mode=pl.Buffered(1)
            # would halve their VMEM once G > 1 / TBc grows.
            pl.BlockSpec((TBc * N, TBc * E), lambda g: (0, 0)),
            pl.BlockSpec((lay["rows"], lw), lambda g: (0, 0)),
        ],
        out_specs=pl.BlockSpec((1, TBc * N, lw), lambda g: (g, 0, 0)),
        compiler_params=pltpu.CompilerParams(
            dimension_semantics=("parallel",),
            vmem_limit_bytes=32 * 1024 * 1024),
    )(xp, pre, rtx, agg_mat, slab)

    return out.reshape(B, Ts, N, lw)[..., :D]


@functools.partial(jax.jit, static_argnames=("pred_steps",))
def mlp_decoder_forward(inputs, rel_type, rel_rec, rel_send, params, pred_steps=1):
    """inputs: [B, N, T, D], rel_type: [B, E, K], rel_rec/rel_send: [E, N]."""
    B, N, T, D = inputs.shape
    E, K = rel_type.shape[1], rel_type.shape[2]
    x = jnp.transpose(inputs, (0, 2, 1, 3))                        # [B, T, N, D]
    rt = jnp.broadcast_to(rel_type[:, None, :, :], (B, T, E, K))
    assert pred_steps <= T

    slab = _pack_params(params)                                    # packed once

    # TODO(synk): for pred_steps > 1, fold the autoregressive loop into the
    # kernel (grid axis over steps + input_output_aliases) so the weight slab
    # and aggregation matrix stay resident in VMEM; at pred_steps == 1 this
    # loop runs exactly once.
    last_pred = x[:, 0::pred_steps]
    curr_rt = rt[:, 0::pred_steps]
    preds = []
    for _ in range(pred_steps):
        last_pred = _single_step(last_pred, curr_rt, rel_rec, rel_send, slab)
        preds.append(last_pred)

    Ts = preds[0].shape[1]
    output = jnp.zeros((B, Ts * pred_steps, N, D), jnp.float32)
    for i, p in enumerate(preds):
        output = output.at[:, i::pred_steps].set(p)
    pred_all = output[:, : T - 1]
    return jnp.transpose(pred_all, (0, 2, 1, 3))                   # [B, N, T-1, D]


def init_params(key):
    """Deterministic PyTorch-Linear-style init (uniform +/- 1/sqrt(fan_in))."""
    D, K, H, M, NH = N_IN_NODE, EDGE_TYPES, MSG_HID, MSG_OUT, N_HID
    ks = jax.random.split(key, 10)

    def u(k, shape, fan_in):
        b = 1.0 / (fan_in ** 0.5)
        return jax.random.uniform(k, shape, jnp.float32, -b, b)

    return {
        "w1":  u(ks[0], (K, 2 * D, H), 2 * D),
        "b1":  u(ks[1], (K, H), 2 * D),
        "w2":  u(ks[2], (K, H, M), H),
        "b2":  u(ks[3], (K, M), H),
        "wo1": u(ks[4], (D + M, NH), D + M),
        "bo1": u(ks[5], (1, NH), D + M),
        "wo2": u(ks[6], (NH, NH), NH),
        "bo2": u(ks[7], (1, NH), NH),
        "wo3": u(ks[8], (NH, D), NH),
        "bo3": u(ks[9], (1, D), NH),
    }


def reference_forward(inputs, rel_type, rel_rec, rel_send, params, pred_steps=1):
    """Pure-JAX reference mirroring the PyTorch forward (for a sanity check)."""
    def single_step(x, rt):
        recv = jnp.einsum("en,btnd->bted", rel_rec, x)
        send = jnp.einsum("en,btnd->bted", rel_send, x)
        pre = jnp.concatenate([recv, send], axis=-1)
        all_msgs = jnp.zeros(pre.shape[:-1] + (MSG_OUT,), jnp.float32)
        for i in range(1 if SKIP_FIRST else 0, EDGE_TYPES):
            h = jax.nn.relu(pre @ params["w1"][i] + params["b1"][i])
            m = jax.nn.relu(h @ params["w2"][i] + params["b2"][i])
            all_msgs = all_msgs + m * rt[..., i:i + 1]
        agg = jnp.einsum("btem,en->btnm", all_msgs, rel_rec)
        aug = jnp.concatenate([x, agg], axis=-1)
        h1 = jax.nn.relu(aug @ params["wo1"] + params["bo1"])
        h2 = jax.nn.relu(h1 @ params["wo2"] + params["bo2"])
        return x + (h2 @ params["wo3"] + params["bo3"])

    B, N, T, D = inputs.shape
    x = jnp.transpose(inputs, (0, 2, 1, 3))
    rt = jnp.broadcast_to(rel_type[:, None], (B, T) + rel_type.shape[1:])
    last, crt = x[:, 0::pred_steps], rt[:, 0::pred_steps]
    preds = []
    for _ in range(pred_steps):
        last = single_step(last, crt)
        preds.append(last)
    out = jnp.zeros((B, preds[0].shape[1] * pred_steps, N, D), jnp.float32)
    for i, p in enumerate(preds):
        out = out.at[:, i::pred_steps].set(p)
    return jnp.transpose(out[:, : T - 1], (0, 2, 1, 3))


if __name__ == "__main__":
    key = jax.random.PRNGKey(0)
    kp, kx, kr = jax.random.split(key, 3)

    B, N, T, D = 2, 5, 8, N_IN_NODE      # batch, atoms, timesteps, dims
    E = N * (N - 1)                      # fully connected graph, no self-loops

    params = init_params(kp)
    inputs = jax.random.normal(kx, (B, N, T, D), jnp.float32)
    rel_type = jax.nn.softmax(
        jax.random.normal(kr, (B, E, EDGE_TYPES), jnp.float32), axis=-1)

    recv_idx = jnp.array([i for i in range(N) for j in range(N) if i != j], jnp.int32)
    send_idx = jnp.array([j for i in range(N) for j in range(N) if i != j], jnp.int32)
    rel_rec = jax.nn.one_hot(recv_idx, N, dtype=jnp.float32)
    rel_send = jax.nn.one_hot(send_idx, N, dtype=jnp.float32)

    out = mlp_decoder_forward(inputs, rel_type, rel_rec, rel_send, params,
                              pred_steps=1)
    out = jax.block_until_ready(out)

    with jax.default_matmul_precision("highest"):
        ref = reference_forward(inputs, rel_type, rel_rec, rel_send, params,
                                pred_steps=1)
    assert out.shape == (B, N, T - 1, D), out.shape
    assert jnp.allclose(out, ref, atol=1e-4, rtol=1e-4), \
        float(jnp.max(jnp.abs(out - ref)))
    print("KERNEL_OK")
</pallas_src>

<mosaic_0001>
module attributes {stable_mosaic.version = 11 : i64} {
  func.func @mlp_decoder_kernel(%arg0: i32, %arg1: memref<1x80x64xf32, #tpu.memory_space<vmem>>, %arg2: memref<1x320x64xf32, #tpu.memory_space<vmem>>, %arg3: memref<1x320x64xf32, #tpu.memory_space<vmem>>, %arg4: memref<80x320xf32, #tpu.memory_space<vmem>>, %arg5: memref<392x64xf32, #tpu.memory_space<vmem>>, %arg6: memref<1x80x64xf32, #tpu.memory_space<vmem>>) attributes {dimension_semantics = [#tpu.dimension_semantics<parallel>], iteration_bounds = array<i64: 1>, scalar_prefetch = 0 : i64, scratch_operands = 0 : i64, tpu.core_type = #tpu.core_type<tc>, window_params = [{transform_indices = @transform_0, window_bounds = array<i64: 1, 80, 64>}, {transform_indices = @transform_1, window_bounds = array<i64: 1, 320, 64>}, {transform_indices = @transform_2, window_bounds = array<i64: 1, 320, 64>}, {pipeline_mode = #tpu.pipeline_mode<synchronous>, transform_indices = @transform_3, window_bounds = array<i64: 80, 320>}, {pipeline_mode = #tpu.pipeline_mode<synchronous>, transform_indices = @transform_4, window_bounds = array<i64: 392, 64>}, {transform_indices = @transform_5, window_bounds = array<i64: 1, 80, 64>}]} {
    %c0 = arith.constant 0 : index
    %c0_0 = arith.constant 0 : index
    %c0_1 = arith.constant 0 : index
    %0 = vector.load %arg1[%c0, %c0_0, %c0_1] : memref<1x80x64xf32, #tpu.memory_space<vmem>>, vector<1x80x64xf32>
    %1 = vector.shape_cast %0 : vector<1x80x64xf32> to vector<80x64xf32>
    %c0_2 = arith.constant 0 : index
    %c0_3 = arith.constant 0 : index
    %c0_4 = arith.constant 0 : index
    %2 = vector.load %arg2[%c0_2, %c0_3, %c0_4] : memref<1x320x64xf32, #tpu.memory_space<vmem>>, vector<1x320x64xf32>
    %3 = vector.shape_cast %2 : vector<1x320x64xf32> to vector<320x64xf32>
    %c0_5 = arith.constant 0 : index
    %c0_6 = arith.constant 0 : index
    %c0_7 = arith.constant 0 : index
    %4 = vector.load %arg3[%c0_5, %c0_6, %c0_7] : memref<1x320x64xf32, #tpu.memory_space<vmem>>, vector<1x320x64xf32>
    %5 = vector.shape_cast %4 : vector<1x320x64xf32> to vector<320x64xf32>
    %c0_8 = arith.constant 0 : index
    %c0_9 = arith.constant 0 : index
    %6 = vector.load %arg5[%c0_8, %c0_9] : memref<392x64xf32, #tpu.memory_space<vmem>>, vector<64x64xf32>
    %c64 = arith.constant 64 : index
    %c0_10 = arith.constant 0 : index
    %7 = vector.load %arg5[%c64, %c0_10] : memref<392x64xf32, #tpu.memory_space<vmem>>, vector<64x64xf32>
    %c128 = arith.constant 128 : index
    %c0_11 = arith.constant 0 : index
    %8 = vector.load %arg5[%c128, %c0_11] : memref<392x64xf32, #tpu.memory_space<vmem>>, vector<64x64xf32>
    %c192 = arith.constant 192 : index
    %c0_12 = arith.constant 0 : index
    %9 = vector.load %arg5[%c192, %c0_12] : memref<392x64xf32, #tpu.memory_space<vmem>>, vector<64x64xf32>
    %c256 = arith.constant 256 : index
    %c0_13 = arith.constant 0 : index
    %10 = vector.load %arg5[%c256, %c0_13] : memref<392x64xf32, #tpu.memory_space<vmem>>, vector<64x64xf32>
    %c320 = arith.constant 320 : index
    %c0_14 = arith.constant 0 : index
    %11 = vector.load %arg5[%c320, %c0_14] : memref<392x64xf32, #tpu.memory_space<vmem>>, vector<64x64xf32>
    %c384 = arith.constant 384 : index
    %c0_15 = arith.constant 0 : index
    %12 = vector.load %arg5[%c384, %c0_15] : memref<392x64xf32, #tpu.memory_space<vmem>>, vector<1x64xf32>
    %c385 = arith.constant 385 : index
    %c0_16 = arith.constant 0 : index
    %13 = vector.load %arg5[%c385, %c0_16] : memref<392x64xf32, #tpu.memory_space<vmem>>, vector<1x64xf32>
    %c386 = arith.constant 386 : index
    %c0_17 = arith.constant 0 : index
    %14 = vector.load %arg5[%c386, %c0_17] : memref<392x64xf32, #tpu.memory_space<vmem>>, vector<1x64xf32>
    %c387 = arith.constant 387 : index
    %c0_18 = arith.constant 0 : index
    %15 = vector.load %arg5[%c387, %c0_18] : memref<392x64xf32, #tpu.memory_space<vmem>>, vector<1x64xf32>
    %c388 = arith.constant 388 : index
    %c0_19 = arith.constant 0 : index
    %16 = vector.load %arg5[%c388, %c0_19] : memref<392x64xf32, #tpu.memory_space<vmem>>, vector<1x64xf32>
    %cst = arith.constant dense<0.000000e+00> : vector<320x64xf32>
    %17 = tpu.matmul %3, %6, %cst {dimension_numbers = #tpu.dot_dimension_numbers<[1], [0], [0], [1], [0, 0, 1, 1], [], []>} : vector<320x64xf32>, vector<64x64xf32>, vector<320x64xf32> -> vector<320x64xf32>
    %18 = vector.broadcast %12 : vector<1x64xf32> to vector<320x64xf32>
    %19 = arith.addf %17, %18 : vector<320x64xf32>
    %cst_20 = arith.constant 0.000000e+00 : f32
    %20 = vector.broadcast %cst_20 : f32 to vector<320x64xf32>
    %21 = arith.maximumf %19, %20 : vector<320x64xf32>
    %cst_21 = arith.constant dense<0.000000e+00> : vector<320x64xf32>
    %22 = tpu.matmul %21, %7, %cst_21 {dimension_numbers = #tpu.dot_dimension_numbers<[1], [0], [0], [1], [0, 0, 1, 1], [], []>} : vector<320x64xf32>, vector<64x64xf32>, vector<320x64xf32> -> vector<320x64xf32>
    %23 = vector.broadcast %13 : vector<1x64xf32> to vector<320x64xf32>
    %24 = arith.addf %22, %23 : vector<320x64xf32>
    %cst_22 = arith.constant 0.000000e+00 : f32
    %25 = vector.broadcast %cst_22 : f32 to vector<320x64xf32>
    %26 = arith.maximumf %24, %25 : vector<320x64xf32>
    %27 = arith.mulf %26, %5 : vector<320x64xf32>
    %c0_23 = arith.constant 0 : index
    %c0_24 = arith.constant 0 : index
    %28 = vector.load %arg4[%c0_23, %c0_24] : memref<80x320xf32, #tpu.memory_space<vmem>>, vector<80x320xf32>
    %cst_25 = arith.constant dense<0.000000e+00> : vector<80x64xf32>
    %29 = tpu.matmul %28, %27, %cst_25 {dimension_numbers = #tpu.dot_dimension_numbers<[1], [0], [0], [1], [0, 0, 1, 1], [], []>} : vector<80x320xf32>, vector<320x64xf32>, vector<80x64xf32> -> vector<80x64xf32>
    %cst_26 = arith.constant dense<0.000000e+00> : vector<80x64xf32>
    %30 = tpu.matmul %1, %8, %cst_26 {dimension_numbers = #tpu.dot_dimension_numbers<[1], [0], [0], [1], [0, 0, 1, 1], [], []>} : vector<80x64xf32>, vector<64x64xf32>, vector<80x64xf32> -> vector<80x64xf32>
    %cst_27 = arith.constant dense<0.000000e+00> : vector<80x64xf32>
    %31 = tpu.matmul %29, %9, %cst_27 {dimension_numbers = #tpu.dot_dimension_numbers<[1], [0], [0], [1], [0, 0, 1, 1], [], []>} : vector<80x64xf32>, vector<64x64xf32>, vector<80x64xf32> -> vector<80x64xf32>
    %32 = arith.addf %30, %31 : vector<80x64xf32>
    %33 = vector.broadcast %14 : vector<1x64xf32> to vector<80x64xf32>
    %34 = arith.addf %32, %33 : vector<80x64xf32>
    %cst_28 = arith.constant 0.000000e+00 : f32
    %35 = vector.broadcast %cst_28 : f32 to vector<80x64xf32>
    %36 = arith.maximumf %34, %35 : vector<80x64xf32>
    %cst_29 = arith.constant dense<0.000000e+00> : vector<80x64xf32>
    %37 = tpu.matmul %36, %10, %cst_29 {dimension_numbers = #tpu.dot_dimension_numbers<[1], [0], [0], [1], [0, 0, 1, 1], [], []>} : vector<80x64xf32>, vector<64x64xf32>, vector<80x64xf32> -> vector<80x64xf32>
    %38 = vector.broadcast %15 : vector<1x64xf32> to vector<80x64xf32>
    %39 = arith.addf %37, %38 : vector<80x64xf32>
    %cst_30 = arith.constant 0.000000e+00 : f32
    %40 = vector.broadcast %cst_30 : f32 to vector<80x64xf32>
    %41 = arith.maximumf %39, %40 : vector<80x64xf32>
    %cst_31 = arith.constant dense<0.000000e+00> : vector<80x64xf32>
    %42 = tpu.matmul %41, %11, %cst_31 {dimension_numbers = #tpu.dot_dimension_numbers<[1], [0], [0], [1], [0, 0, 1, 1], [], []>} : vector<80x64xf32>, vector<64x64xf32>, vector<80x64xf32> -> vector<80x64xf32>
    %43 = vector.broadcast %16 : vector<1x64xf32> to vector<80x64xf32>
    %44 = arith.addf %42, %43 : vector<80x64xf32>
    %45 = arith.addf %1, %44 : vector<80x64xf32>
    %c0_32 = arith.constant 0 : index
    %c0_33 = arith.constant 0 : index
    %c0_34 = arith.constant 0 : index
    %46 = vector.load %arg6[%c0_32, %c0_33, %c0_34] : memref<1x80x64xf32, #tpu.memory_space<vmem>>, vector<1x80x64xf32>
    %47 = vector.shape_cast %46 : vector<1x80x64xf32> to vector<80x64xf32>
    %48 = vector.shape_cast %45 : vector<80x64xf32> to vector<1x80x64xf32>
    tpu.vector_store %arg6[%c0_32, %c0_33, %c0_34], %48 {strides = array<i32>} : memref<1x80x64xf32, #tpu.memory_space<vmem>>, vector<1x80x64xf32>,
    return
  }
  func.func @transform_0(%arg0: i32) -> (i32, i32, i32) {
    %c0_i32 = arith.constant 0 : i32
    %c0_i32_0 = arith.constant 0 : i32
    %c0_i32_1 = arith.constant 0 : i32
    return %arg0, %c0_i32, %c0_i32_0 : i32, i32, i32
  }
  func.func @transform_1(%arg0: i32) -> (i32, i32, i32) {
    %c0_i32 = arith.constant 0 : i32
    %c0_i32_0 = arith.constant 0 : i32
    %c0_i32_1 = arith.constant 0 : i32
    return %arg0, %c0_i32, %c0_i32_0 : i32, i32, i32
  }
  func.func @transform_2(%arg0: i32) -> (i32, i32, i32) {
    %c0_i32 = arith.constant 0 : i32
    %c0_i32_0 = arith.constant 0 : i32
    %c0_i32_1 = arith.constant 0 : i32
    return %arg0, %c0_i32, %c0_i32_0 : i32, i32, i32
  }
  func.func @transform_3(%arg0: i32) -> (i32, i32) {
    %c0_i32 = arith.constant 0 : i32
    %c0_i32_0 = arith.constant 0 : i32
    %c0_i32_1 = arith.constant 0 : i32
    return %c0_i32, %c0_i32_0 : i32, i32
  }
  func.func @transform_4(%arg0: i32) -> (i32, i32) {
    %c0_i32 = arith.constant 0 : i32
    %c0_i32_0 = arith.constant 0 : i32
    %c0_i32_1 = arith.constant 0 : i32
    return %c0_i32, %c0_i32_0 : i32, i32
  }
  func.func @transform_5(%arg0: i32) -> (i32, i32, i32) {
    %c0_i32 = arith.constant 0 : i32
    %c0_i32_0 = arith.constant 0 : i32
    %c0_i32_1 = arith.constant 0 : i32
    return %arg0, %c0_i32, %c0_i32_0 : i32, i32, i32
  }
}

</mosaic_0001>

<bundles_post_ra>
// kernel: mlp_decoder_forward.1
= control target key start
LH: loop header
LB: loop body
LE: loop exit
PB: predicated region body
PF: predicated region fallthrough
CT: control target
= control target key end

     0   :  { %vm167_vm0 = vcmask 523264   ;;  %s3765_s4 = inlined_call_operand.vmem [shape: f32[392,64], index: 4, kind: input, shape index: {}]   ;;  %s3766_s1 = inlined_call_operand.vmem [shape: f32[1,320,64], index: 1, kind: input, shape index: {}]   ;;  %s3767_s3 = inlined_call_operand.vmem [shape: f32[80,320], index: 3, kind: input, shape index: {}]   ;;  %s3768_s2 = inlined_call_operand.vmem [shape: f32[1,320,64], index: 2, kind: input, shape index: {}]   ;;  %s3769_s0 = inlined_call_operand.vmem [shape: f32[1,80,64], index: 0, kind: input, shape index: {}]   ;;  %s3770_s5 = inlined_call_operand.vmem [shape: f32[1,80,64], index: 5, kind: output, shape index: {}]  }
   0x1   :  { %v110_v0 = vld [vmem:[%s3765_s4] sm:$0xff]  ;;  %v111_v1 = vld [vmem:[%s3765_s4 + $0x8] sm:$0xff]  ;;  %v112_v2 = vld [vmem:[%s3765_s4 + $0x10] sm:$0xff] }
   0x2   :  { %v2688_v3 = vpack.c.bf16 %v111_v1, %v110_v0  ;;  %v113_v4 = vld [vmem:[%s3765_s4 + $0x18] sm:$0xff]  ;;  %v114_v6 = vld [vmem:[%s3765_s4 + $0x20] sm:$0xff]  ;;  %v115_v7 = vld [vmem:[%s3765_s4 + $0x28] sm:$0xff] }
   0x3   :  { %v2692_v5 = vpack.c.bf16 %v113_v4, %v112_v2  ;;  %v30_v8 = vld [vmem:[%s3766_s1] sm:$0xff]  ;;  %v2696_v9 = vpack.c.bf16 %v115_v7, %v114_v6  ;;  %v116_v10 = vld [vmem:[%s3765_s4 + $0x30] sm:$0xff]  ;;  %v117_v11 = vld [vmem:[%s3765_s4 + $0x38] sm:$0xff] }
   0x4   :  { %2689 = vmatprep.subr.bf16.mxu0 %v2688_v3  ;;  %2397 = vmatprep.mubr.msk.f32.mxu0 %vm167_vm0, %v30_v8  ;;  %v2700_v12 = vpack.c.bf16 %v117_v11, %v116_v10  ;;  %v31_v13 = vld [vmem:[%s3766_s1 + $0x8] sm:$0xff]  ;;  %v118_v14 = vld [vmem:[%s3765_s4 + $0x40] sm:$0xff]  ;;  %v120_v16 = vld [vmem:[%s3765_s4 + $0x50] sm:$0xff] }
   0x5   :  { %2691 = vmatpush3.bf16.msra.mxu0 %v2688_v3  ;;  %v119_v15 = vld [vmem:[%s3765_s4 + $0x48] sm:$0xff]  ;;  %v32_v17 = vld [vmem:[%s3766_s1 + $0x10] sm:$0xff]  ;;  %v121_v19 = vld [vmem:[%s3765_s4 + $0x58] sm:$0xff] }
   0x6   :  { %2693 = vmatprep.subr.bf16.mxu0 %v2692_v5  ;;  %v2704_v18 = vpack.c.bf16 %v119_v15, %v118_v14  ;;  %v2708_v20 = vpack.c.bf16 %v121_v19, %v120_v16  ;;  %v122_v21 = vld [vmem:[%s3765_s4 + $0x60] sm:$0xff]  ;;  %v123_v22 = vld [vmem:[%s3765_s4 + $0x68] sm:$0xff]  ;;  %v33_v23 = vld [vmem:[%s3766_s1 + $0x18] sm:$0xff] }
   0x7   :  { %v34_v24 = vld [vmem:[%s3766_s1 + $0x20] sm:$0xff]  ;;  %v2712_v25 = vpack.c.bf16 %v123_v22, %v122_v21  ;;  %v35_v26 = vld [vmem:[%s3766_s1 + $0x28] sm:$0xff]  ;;  %v36_v27 = vld [vmem:[%s3766_s1 + $0x30] sm:$0xff] }
   0x8   :  { %2705 = vmatprep.subr.bf16.mxu1 %v2704_v18  ;;  %v37_v28 = vld [vmem:[%s3766_s1 + $0x38] sm:$0xff]  ;;  %v38_v29 = vld [vmem:[%s3766_s1 + $0x40] sm:$0xff]  ;;  %v39_v30 = vld [vmem:[%s3766_s1 + $0x48] sm:$0xff] }
   0x9   :  { %2695 = vmatpush3.bf16.msra.mxu0 %v2692_v5  ;;  %2707 = vmatpush3.bf16.msra.mxu1 %v2704_v18  ;;  %v40_v31 = vld [vmem:[%s3766_s1 + $0x50] sm:$0xff]  ;;  %v41_v32 = vld [vmem:[%s3766_s1 + $0x58] sm:$0xff]  ;;  %v42_v33 = vld [vmem:[%s3766_s1 + $0x60] sm:$0xff] }
   0xa   :  { %2697 = vmatprep.subr.bf16.mxu0 %v2696_v9  ;;  %2709 = vmatprep.subr.bf16.mxu1 %v2708_v20  ;;  %v43_v34 = vld [vmem:[%s3766_s1 + $0x68] sm:$0xff]  ;;  %v44_v35 = vld [vmem:[%s3766_s1 + $0x70] sm:$0xff]  ;;  %v45_v36 = vld [vmem:[%s3766_s1 + $0x78] sm:$0xff] }
   0xb   :  { %v46_v37 = vld [vmem:[%s3766_s1 + $0x80] sm:$0xff]  ;;  %v47_v38 = vld [vmem:[%s3766_s1 + $0x88] sm:$0xff]  ;;  %v48_v39 = vld [vmem:[%s3766_s1 + $0x90] sm:$0xff] }
   0xc   :  { %v49_v40 = vld [vmem:[%s3766_s1 + $0x98] sm:$0xff]  ;;  %v50_v41 = vld [vmem:[%s3766_s1 + $0xa0] sm:$0xff]  ;;  %v51_v42 = vld [vmem:[%s3766_s1 + $0xa8] sm:$0xff] }
   0xd   :  { %2699 = vmatpush3.bf16.msra.mxu0 %v2696_v9  ;;  %2711 = vmatpush3.bf16.msra.mxu1 %v2708_v20  ;;  %v52_v43 = vld [vmem:[%s3766_s1 + $0xb0] sm:$0xff]  ;;  %v53_v44 = vld [vmem:[%s3766_s1 + $0xb8] sm:$0xff]  ;;  %v54_v45 = vld [vmem:[%s3766_s1 + $0xc0] sm:$0xff] }
   0xe   :  { %2701 = vmatprep.subr.bf16.mxu0 %v2700_v12  ;;  %2713 = vmatprep.subr.bf16.mxu1 %v2712_v25  ;;  %v55_v46 = vld [vmem:[%s3766_s1 + $0xc8] sm:$0xff]  ;;  %v56_v47 = vld [vmem:[%s3766_s1 + $0xd0] sm:$0xff]  ;;  %v57_v48 = vld [vmem:[%s3766_s1 + $0xd8] sm:$0xff] }
   0xf   :  { %v58_v49 = vld [vmem:[%s3766_s1 + $0xe0] sm:$0xff]  ;;  %v59_v50 = vld [vmem:[%s3766_s1 + $0xe8] sm:$0xff]  ;;  %v60_v51 = vld [vmem:[%s3766_s1 + $0xf0] sm:$0xff] }
  0x10   :  { %v61_v52 = vld [vmem:[%s3766_s1 + $0xf8] sm:$0xff]  ;;  %v62_v53 = vld [vmem:[%s3766_s1 + $0x100] sm:$0xff]  ;;  %v63_v54 = vld [vmem:[%s3766_s1 + $0x108] sm:$0xff] }
  0x11   :  { %2703 = vmatpush3.bf16.msra.mxu0 %v2700_v12  ;;  %2715 = vmatpush3.bf16.msra.mxu1 %v2712_v25  ;;  %v64_v55 = vld [vmem:[%s3766_s1 + $0x110] sm:$0xff]  ;;  %v65_v56 = vld [vmem:[%s3766_s1 + $0x118] sm:$0xff]  ;;  %v66_v57 = vld [vmem:[%s3766_s1 + $0x120] sm:$0xff] }
  0x12   :  { %v67_v58 = vld [vmem:[%s3766_s1 + $0x128] sm:$0xff]  ;;  %v68_v59 = vld [vmem:[%s3766_s1 + $0x130] sm:$0xff]  ;;  %v69_v60 = vld [vmem:[%s3766_s1 + $0x138] sm:$0xff] }
  0x13   :  { %v124_v61 = vld [vmem:[%s3765_s4 + $0x70] sm:$0xff]  ;;  %v125_v62 = vld [vmem:[%s3765_s4 + $0x78] sm:$0xff]  ;;  %v3091_v0 = vld [vmem:[%s3765_s4 + $0x180] ss:$0 sm:$0xff] }
  0x14   :  { %2398 = vmatmul.mubr.msk.f32.vlgmr.msra.gmra.mrb[0].mxu0 %vm167_vm0, %v31_v13  ;;  %v2716_v63 = vpack.c.bf16 %v125_v62, %v124_v61 }
  0x15   :  { %2400 = vmatprep.mubr.msk.f32.mxu0 %vm167_vm0, %v32_v17 }
  0x16   :  { %2717 = vmatprep.subr.bf16.mxu1 %v2716_v63 }
  0x17   :  { %2719 = vmatpush3.bf16.msra.mxu1 %v2716_v63 }
  0x18   :  { %2401 = vmatmul.mubr.msk.f32.gmra.mrb[2].mxu0 %vm167_vm0, %v33_v23 }
  0x19   :  { %2403 = vmatprep.mubr.msk.f32.mxu0 %vm167_vm0, %v34_v24 }
  0x1c   :  { %2404 = vmatmul.mubr.msk.f32.gmra.mrb[4].mxu0 %vm167_vm0, %v35_v26 }
  0x1d   :  { %2406 = vmatprep.mubr.msk.f32.mxu0 %vm167_vm0, %v36_v27 }
  0x20   :  { %2407 = vmatmul.mubr.msk.f32.gmra.mrb[6].mxu0 %vm167_vm0, %v37_v28 }
  0x21   :  { %2409 = vmatprep.mubr.msk.f32.mxu0 %vm167_vm0, %v38_v29 }
  0x24   :  { %2410 = vmatmul.mubr.msk.f32.gmra.mrb[8].mxu0 %vm167_vm0, %v39_v30 }
  0x25   :  { %2412 = vmatprep.mubr.msk.f32.mxu0 %vm167_vm0, %v40_v31 }
  0x28   :  { %2413 = vmatmul.mubr.msk.f32.gmra.mrb[10].mxu0 %vm167_vm0, %v41_v32 }
  0x29   :  { %2415 = vmatprep.mubr.msk.f32.mxu0 %vm167_vm0, %v42_v33 }
  0x2c   :  { %2416 = vmatmul.mubr.msk.f32.gmra.mrb[12].mxu0 %vm167_vm0, %v43_v34 }
  0x2d   :  { %2418 = vmatprep.mubr.msk.f32.mxu0 %vm167_vm0, %v44_v35 }
  0x30   :  { %2419 = vmatmul.mubr.msk.f32.gmra.mrb[14].mxu0 %vm167_vm0, %v45_v36 }
  0x31   :  { %2421 = vmatprep.mubr.msk.f32.mxu0 %vm167_vm0, %v46_v37 }
  0x34   :  { %2422 = vmatmul.mubr.msk.f32.gmra.mrb[16].mxu0 %vm167_vm0, %v47_v38 }
  0x35   :  { %2424 = vmatprep.mubr.msk.f32.mxu0 %vm167_vm0, %v48_v39 }
  0x38   :  { %2425 = vmatmul.mubr.msk.f32.gmra.mrb[18].mxu0 %vm167_vm0, %v49_v40 }
  0x39   :  { %2427 = vmatprep.mubr.msk.f32.mxu0 %vm167_vm0, %v50_v41 }
  0x3c   :  { %2428 = vmatmul.mubr.msk.f32.gmra.mrb[20].mxu0 %vm167_vm0, %v51_v42 }
  0x3d   :  { %2430 = vmatprep.mubr.msk.f32.mxu0 %vm167_vm0, %v52_v43 }
  0x40   :  { %2431 = vmatmul.mubr.msk.f32.gmra.mrb[22].mxu0 %vm167_vm0, %v53_v44 }
  0x41   :  { %2433 = vmatprep.mubr.msk.f32.mxu0 %vm167_vm0, %v54_v45 }
  0x44   :  { %2434 = vmatmul.mubr.msk.f32.gmra.mrb[24].mxu0 %vm167_vm0, %v55_v46 }
  0x45   :  { %2436 = vmatprep.mubr.msk.f32.mxu0 %vm167_vm0, %v56_v47 }
  0x48   :  { %2437 = vmatmul.mubr.msk.f32.gmra.mrb[26].mxu0 %vm167_vm0, %v57_v48 }
  0x49   :  { %2439 = vmatprep.mubr.msk.f32.mxu0 %vm167_vm0, %v58_v49 }
  0x4c   :  { %2440 = vmatmul.mubr.msk.f32.gmra.mrb[28].mxu0 %vm167_vm0, %v59_v50 }
  0x4d   :  { %2442 = vmatprep.mubr.msk.f32.mxu0 %vm167_vm0, %v60_v51 }
  0x50   :  { %2443 = vmatmul.mubr.msk.f32.gmra.mrb[30].mxu0 %vm167_vm0, %v61_v52 }
  0x51   :  { %2445 = vmatprep.mubr.msk.f32.mxu0 %vm167_vm0, %v62_v53 }
  0x54   :  { %2446 = vmatmul.mubr.msk.f32.gmra.mrb[32].mxu0 %vm167_vm0, %v63_v54 }
  0x55   :  { %2448 = vmatprep.mubr.msk.f32.mxu0 %vm167_vm0, %v64_v55 }
  0x58   :  { %2449 = vmatmul.mubr.msk.f32.gmra.mrb[34].mxu0 %vm167_vm0, %v65_v56 }
  0x59   :  { %2451 = vmatprep.mubr.msk.f32.mxu0 %vm167_vm0, %v66_v57 }
  0x5c   :  { %2452 = vmatmul.mubr.msk.f32.gmra.mrb[36].mxu0 %vm167_vm0, %v67_v58 }
  0x5d   :  { %2454 = vmatprep.mubr.msk.f32.mxu0 %vm167_vm0, %v68_v59 }
  0x60   :  { %2455 = vmatmul.mubr.msk.f32.gmra.mrb[38].mxu0 %vm167_vm0, %v69_v60 }
  0xe7   :  { %v2399_v1 = vpop.f32.mrb[0].mxu0 }
  0xe8   :  { %v360_v2 = vadd.f32 %v2399_v1, %v3091_v0  ;;  %v354_v3 = vpop.f32.mrb[1].mxu0 }
  0xe9   :  { %v355_v4 = vadd.f32 %v3091_v0, %v354_v3 }
  0xea   :  { %v554_v7 = vmax.f32 %v360_v2, 0.0 }
  0xeb   :  { %v553_v5 = vmax.f32 %v355_v4, 0.0  ;;  %v2402_v6 = vpop.f32.mrb[2].mxu0 }
  0xec   :  { %v370_v8 = vadd.f32 %v2402_v6, %v3091_v0  ;;  %v364_v9 = vpop.f32.mrb[3].mxu0 }
  0xed   :  { %v365_v10 = vadd.f32 %v3091_v0, %v364_v9  ;;  %2473 = vmatprep.mubr.msk.f32.mxu1 %vm167_vm0, %v553_v5 }
  0xee   :  { %2474 = vmatmul.mubr.msk.f32.vlgmr.msra.gmra.mrb[0].mxu1 %vm167_vm0, %v554_v7  ;;  %v556_v13 = vmax.f32 %v370_v8, 0.0 }
  0xef   :  { %v555_v11 = vmax.f32 %v365_v10, 0.0  ;;  %v2405_v12 = vpop.f32.mrb[4].mxu0 }
  0xf0   :  { %v380_v14 = vadd.f32 %v2405_v12, %v3091_v0  ;;  %v374_v15 = vpop.f32.mrb[5].mxu0 }
  0xf1   :  { %v375_v16 = vadd.f32 %v3091_v0, %v374_v15  ;;  %2476 = vmatprep.mubr.msk.f32.mxu1 %vm167_vm0, %v555_v11 }
  0xf2   :  { %2477 = vmatmul.mubr.msk.f32.gmra.mrb[2].mxu1 %vm167_vm0, %v556_v13  ;;  %v558_v19 = vmax.f32 %v380_v14, 0.0 }
  0xf3   :  { %v557_v17 = vmax.f32 %v375_v16, 0.0  ;;  %v2408_v18 = vpop.f32.mrb[6].mxu0 }
  0xf4   :  { %v390_v20 = vadd.f32 %v2408_v18, %v3091_v0  ;;  %v384_v21 = vpop.f32.mrb[7].mxu0 }
  0xf5   :  { %v385_v22 = vadd.f32 %v3091_v0, %v384_v21  ;;  %2479 = vmatprep.mubr.msk.f32.mxu1 %vm167_vm0, %v557_v17 }
  0xf6   :  { %2480 = vmatmul.mubr.msk.f32.gmra.mrb[4].mxu1 %vm167_vm0, %v558_v19  ;;  %v560_v25 = vmax.f32 %v390_v20, 0.0 }
  0xf7   :  { %v559_v23 = vmax.f32 %v385_v22, 0.0  ;;  %v2411_v24 = vpop.f32.mrb[8].mxu0 }
  0xf8   :  { %v400_v26 = vadd.f32 %v2411_v24, %v3091_v0  ;;  %v394_v27 = vpop.f32.mrb[9].mxu0 }
  0xf9   :  { %v395_v28 = vadd.f32 %v3091_v0, %v394_v27  ;;  %2482 = vmatprep.mubr.msk.f32.mxu1 %vm167_vm0, %v559_v23 }
  0xfa   :  { %2483 = vmatmul.mubr.msk.f32.gmra.mrb[6].mxu1 %vm167_vm0, %v560_v25  ;;  %v562_v31 = vmax.f32 %v400_v26, 0.0 }
  0xfb   :  { %v561_v29 = vmax.f32 %v395_v28, 0.0  ;;  %v2414_v30 = vpop.f32.mrb[10].mxu0 }
  0xfc   :  { %v410_v32 = vadd.f32 %v2414_v30, %v3091_v0  ;;  %v404_v33 = vpop.f32.mrb[11].mxu0 }
  0xfd   :  { %v405_v34 = vadd.f32 %v3091_v0, %v404_v33  ;;  %2485 = vmatprep.mubr.msk.f32.mxu1 %vm167_vm0, %v561_v29 }
  0xfe   :  { %2486 = vmatmul.mubr.msk.f32.gmra.mrb[8].mxu1 %vm167_vm0, %v562_v31  ;;  %v564_v37 = vmax.f32 %v410_v32, 0.0 }
  0xff   :  { %v563_v35 = vmax.f32 %v405_v34, 0.0  ;;  %v2417_v36 = vpop.f32.mrb[12].mxu0 }
 0x100   :  { %v420_v38 = vadd.f32 %v2417_v36, %v3091_v0  ;;  %v414_v39 = vpop.f32.mrb[13].mxu0 }
 0x101   :  { %v415_v40 = vadd.f32 %v3091_v0, %v414_v39  ;;  %2488 = vmatprep.mubr.msk.f32.mxu1 %vm167_vm0, %v563_v35 }
 0x102   :  { %2489 = vmatmul.mubr.msk.f32.gmra.mrb[10].mxu1 %vm167_vm0, %v564_v37  ;;  %v566_v43 = vmax.f32 %v420_v38, 0.0 }
 0x103   :  { %v565_v41 = vmax.f32 %v415_v40, 0.0  ;;  %v2420_v42 = vpop.f32.mrb[14].mxu0 }
 0x104   :  { %v430_v44 = vadd.f32 %v2420_v42, %v3091_v0  ;;  %v424_v45 = vpop.f32.mrb[15].mxu0 }
 0x105   :  { %v425_v46 = vadd.f32 %v3091_v0, %v424_v45  ;;  %2491 = vmatprep.mubr.msk.f32.mxu1 %vm167_vm0, %v565_v41 }
 0x106   :  { %2492 = vmatmul.mubr.msk.f32.gmra.mrb[12].mxu1 %vm167_vm0, %v566_v43  ;;  %v568_v49 = vmax.f32 %v430_v44, 0.0 }
 0x107   :  { %v567_v47 = vmax.f32 %v425_v46, 0.0  ;;  %v2423_v48 = vpop.f32.mrb[16].mxu0 }
 0x108   :  { %v440_v50 = vadd.f32 %v2423_v48, %v3091_v0  ;;  %v434_v51 = vpop.f32.mrb[17].mxu0 }
 0x109   :  { %v435_v52 = vadd.f32 %v3091_v0, %v434_v51  ;;  %2494 = vmatprep.mubr.msk.f32.mxu1 %vm167_vm0, %v567_v47 }
 0x10a   :  { %2495 = vmatmul.mubr.msk.f32.gmra.mrb[14].mxu1 %vm167_vm0, %v568_v49  ;;  %v570_v55 = vmax.f32 %v440_v50, 0.0 }
 0x10b   :  { %v569_v53 = vmax.f32 %v435_v52, 0.0  ;;  %v2426_v54 = vpop.f32.mrb[18].mxu0 }
 0x10c   :  { %v450_v56 = vadd.f32 %v2426_v54, %v3091_v0  ;;  %v444_v57 = vpop.f32.mrb[19].mxu0 }
 0x10d   :  { %v445_v58 = vadd.f32 %v3091_v0, %v444_v57  ;;  %2497 = vmatprep.mubr.msk.f32.mxu1 %vm167_vm0, %v569_v53 }
 0x10e   :  { %2498 = vmatmul.mubr.msk.f32.gmra.mrb[16].mxu1 %vm167_vm0, %v570_v55  ;;  %v572_v61 = vmax.f32 %v450_v56, 0.0 }
 0x10f   :  { %v571_v59 = vmax.f32 %v445_v58, 0.0  ;;  %v2429_v60 = vpop.f32.mrb[20].mxu0  ;;  %v1063_v58 = vld [vmem:[%s3767_s3 + $0x8] sm:$0xff] }
 0x110   :  { %v460_v62 = vadd.f32 %v2429_v60, %v3091_v0  ;;  %v454_v63 = vpop.f32.mrb[21].mxu0  ;;  %1186 = vmatprep.mubr.f32.mxu0 %v1063_v58 }
 0x111   :  { %v455_v1 = vadd.f32 %v3091_v0, %v454_v63  ;;  %2500 = vmatprep.mubr.msk.f32.mxu1 %vm167_vm0, %v571_v59  ;;  %v1064_v59 = vld [vmem:[%s3767_s3 + $0x10] sm:$0xff]  ;;  %v71_v63 = vld [vmem:[%s3768_s2 + $0x8] sm:$0xff] }
 0x112   :  { %2501 = vmatmul.mubr.msk.f32.gmra.mrb[18].mxu1 %vm167_vm0, %v572_v61  ;;  %v574_v4 = vmax.f32 %v460_v62, 0.0 }
 0x113   :  { %v573_v2 = vmax.f32 %v455_v1, 0.0  ;;  %v2432_v3 = vpop.f32.mrb[22].mxu0 }
 0x114   :  { %v470_v5 = vadd.f32 %v2432_v3, %v3091_v0  ;;  %v464_v6 = vpop.f32.mrb[23].mxu0  ;;  %v70_v3 = vld [vmem:[%s3768_s2] sm:$0xff] }
 0x115   :  { %v465_v7 = vadd.f32 %v3091_v0, %v464_v6  ;;  %2503 = vmatprep.mubr.msk.f32.mxu1 %vm167_vm0, %v573_v2 }
 0x116   :  { %2504 = vmatmul.mubr.msk.f32.gmra.mrb[20].mxu1 %vm167_vm0, %v574_v4  ;;  %v576_v10 = vmax.f32 %v470_v5, 0.0 }
 0x117   :  { %v575_v8 = vmax.f32 %v465_v7, 0.0  ;;  %v2435_v9 = vpop.f32.mrb[24].mxu0 }
 0x118   :  { %v480_v11 = vadd.f32 %v2435_v9, %v3091_v0  ;;  %v474_v12 = vpop.f32.mrb[25].mxu0 }
 0x119   :  { %v475_v13 = vadd.f32 %v3091_v0, %v474_v12  ;;  %2506 = vmatprep.mubr.msk.f32.mxu1 %vm167_vm0, %v575_v8 }
 0x11a   :  { %2507 = vmatmul.mubr.msk.f32.gmra.mrb[22].mxu1 %vm167_vm0, %v576_v10  ;;  %v578_v16 = vmax.f32 %v480_v11, 0.0  ;;  %v73_v10 = vld [vmem:[%s3768_s2 + $0x18] sm:$0xff] }
 0x11b   :  { %v577_v14 = vmax.f32 %v475_v13, 0.0  ;;  %v2438_v15 = vpop.f32.mrb[26].mxu0  ;;  %v72_v13 = vld [vmem:[%s3768_s2 + $0x10] sm:$0xff] }
 0x11c   :  { %v490_v17 = vadd.f32 %v2438_v15, %v3091_v0  ;;  %v484_v18 = vpop.f32.mrb[27].mxu0 }
 0x11d   :  { %v485_v19 = vadd.f32 %v3091_v0, %v484_v18  ;;  %2509 = vmatprep.mubr.msk.f32.mxu1 %vm167_vm0, %v577_v14 }
 0x11e   :  { %2510 = vmatmul.mubr.msk.f32.gmra.mrb[24].mxu1 %vm167_vm0, %v578_v16  ;;  %v580_v22 = vmax.f32 %v490_v17, 0.0 }
 0x11f   :  { %v579_v20 = vmax.f32 %v485_v19, 0.0  ;;  %v2441_v21 = vpop.f32.mrb[28].mxu0 }
 0x120   :  { %v500_v23 = vadd.f32 %v2441_v21, %v3091_v0  ;;  %v494_v24 = vpop.f32.mrb[29].mxu0  ;;  %v75_v21 = vld [vmem:[%s3768_s2 + $0x28] sm:$0xff] }
 0x121   :  { %v495_v25 = vadd.f32 %v3091_v0, %v494_v24  ;;  %2512 = vmatprep.mubr.msk.f32.mxu1 %vm167_vm0, %v579_v20  ;;  %v74_v24 = vld [vmem:[%s3768_s2 + $0x20] sm:$0xff] }
 0x122   :  { %2513 = vmatmul.mubr.msk.f32.gmra.mrb[26].mxu1 %vm167_vm0, %v580_v22  ;;  %v582_v28 = vmax.f32 %v500_v23, 0.0 }
 0x123   :  { %v581_v26 = vmax.f32 %v495_v25, 0.0  ;;  %v2444_v27 = vpop.f32.mrb[30].mxu0 }
 0x124   :  { %v510_v29 = vadd.f32 %v2444_v27, %v3091_v0  ;;  %v504_v30 = vpop.f32.mrb[31].mxu0 }
 0x125   :  { %v505_v31 = vadd.f32 %v3091_v0, %v504_v30  ;;  %2515 = vmatprep.mubr.msk.f32.mxu1 %vm167_vm0, %v581_v26 }
 0x126   :  { %2516 = vmatmul.mubr.msk.f32.gmra.mrb[28].mxu1 %vm167_vm0, %v582_v28  ;;  %v584_v34 = vmax.f32 %v510_v29, 0.0 }
 0x127   :  { %v583_v32 = vmax.f32 %v505_v31, 0.0  ;;  %v2447_v33 = vpop.f32.mrb[32].mxu0 }
 0x128   :  { %v520_v35 = vadd.f32 %v2447_v33, %v3091_v0  ;;  %v514_v36 = vpop.f32.mrb[33].mxu0 }
 0x129   :  { %v515_v37 = vadd.f32 %v3091_v0, %v514_v36  ;;  %2518 = vmatprep.mubr.msk.f32.mxu1 %vm167_vm0, %v583_v32  ;;  %v77_v32 = vld [vmem:[%s3768_s2 + $0x38] sm:$0xff] }
 0x12a   :  { %v586_v38 = vmax.f32 %v520_v35, 0.0  ;;  %2519 = vmatmul.mubr.msk.f32.gmra.mrb[30].mxu1 %vm167_vm0, %v584_v34  ;;  %v76_v35 = vld [vmem:[%s3768_s2 + $0x30] sm:$0xff] }
 0x12b   :  { %v585_v39 = vmax.f32 %v515_v37, 0.0  ;;  %v2450_v40 = vpop.f32.mrb[34].mxu0 }
 0x12c   :  { %v530_v41 = vadd.f32 %v2450_v40, %v3091_v0  ;;  %v524_v42 = vpop.f32.mrb[35].mxu0 }
 0x12d   :  { %2521 = vmatprep.mubr.msk.f32.mxu1 %vm167_vm0, %v585_v39  ;;  %v525_v43 = vadd.f32 %v3091_v0, %v524_v42 }
 0x12e   :  { %2522 = vmatmul.mubr.msk.f32.gmra.mrb[32].mxu1 %vm167_vm0, %v586_v38  ;;  %v588_v44 = vmax.f32 %v530_v41, 0.0 }
 0x12f   :  { %v587_v45 = vmax.f32 %v525_v43, 0.0  ;;  %v2453_v46 = vpop.f32.mrb[36].mxu0  ;;  %v79_v43 = vld [vmem:[%s3768_s2 + $0x48] sm:$0xff] }
 0x130   :  { %v540_v47 = vadd.f32 %v2453_v46, %v3091_v0  ;;  %v534_v48 = vpop.f32.mrb[37].mxu0  ;;  %v78_v46 = vld [vmem:[%s3768_s2 + $0x40] sm:$0xff] }
 0x131   :  { %2524 = vmatprep.mubr.msk.f32.mxu1 %vm167_vm0, %v587_v45  ;;  %v535_v49 = vadd.f32 %v3091_v0, %v534_v48 }
 0x132   :  { %2525 = vmatmul.mubr.msk.f32.gmra.mrb[34].mxu1 %vm167_vm0, %v588_v44  ;;  %v590_v50 = vmax.f32 %v540_v47, 0.0 }
 0x133   :  { %v589_v51 = vmax.f32 %v535_v49, 0.0  ;;  %v2456_v52 = vpop.f32.mrb[38].mxu0 }
 0x134   :  { %v550_v53 = vadd.f32 %v2456_v52, %v3091_v0  ;;  %v544_v54 = vpop.f32.mrb[39].mxu0 }
 0x135   :  { %v545_v55 = vadd.f32 %v3091_v0, %v544_v54  ;;  %2527 = vmatprep.mubr.msk.f32.mxu1 %vm167_vm0, %v589_v51  ;;  %v3183_v0 = vld [vmem:[%s3765_s4 + $0x181] ss:$0 sm:$0xff]  ;;  %v81_v54 = vld [vmem:[%s3768_s2 + $0x58] sm:$0xff] }
 0x136   :  { %v592_v56 = vmax.f32 %v550_v53, 0.0  ;;  %2528 = vmatmul.mubr.msk.f32.gmra.mrb[36].mxu1 %vm167_vm0, %v590_v50 }
 0x137   :  { %v591_v57 = vmax.f32 %v545_v55, 0.0 }
 0x139   :  { %2530 = vmatprep.mubr.msk.f32.mxu1 %vm167_vm0, %v591_v57  ;;  %v80_v57 = vld [vmem:[%s3768_s2 + $0x50] sm:$0xff] }
 0x13a   :  { %2531 = vmatmul.mubr.msk.f32.gmra.mrb[38].mxu1 %vm167_vm0, %v592_v56 }
 0x13b   :  { %2549 = vmatprep.mubr.msk.f32.mxu1 %vm167_vm0, %v1064_v59 }
 0x1c1   :  { %v2475_v60 = vpop.f32.mrb[0].mxu1 }
 0x1c2   :  { %v789_v61 = vadd.f32 %v2475_v60, %v3183_v0  ;;  %v783_v62 = vpop.f32.mrb[1].mxu1 }
 0x1c3   :  { %v784_v1 = vadd.f32 %v3183_v0, %v783_v62 }
 0x1c4   :  { %v983_v2 = vmax.f32 %v789_v61, 0.0 }
 0x1c5   :  { %v982_v4 = vmax.f32 %v784_v1, 0.0  ;;  %v2478_v5 = vpop.f32.mrb[2].mxu1 }
 0x1c6   :  { %v3193_v6 = vmul.f32 %v983_v2, %v71_v63  ;;  %v799_v7 = vadd.f32 %v2478_v5, %v3183_v0  ;;  %v793_v8 = vpop.f32.mrb[3].mxu1  ;;  %v83_v2 = vld [vmem:[%s3768_s2 + $0x68] sm:$0xff]  ;;  %v82_v5 = vld [vmem:[%s3768_s2 + $0x60] sm:$0xff] }
 0x1c7   :  { %v3196_v9 = vmul.f32 %v982_v4, %v70_v3  ;;  %v794_v11 = vadd.f32 %v3183_v0, %v793_v8 }
 0x1c8   :  { %v985_v12 = vmax.f32 %v799_v7, 0.0 }
 0x1c9   :  { %v2722_v14 = vpack.c.bf16 %v3193_v6, %v3196_v9  ;;  %v984_v15 = vmax.f32 %v794_v11, 0.0  ;;  %v2481_v16 = vpop.f32.mrb[4].mxu1  ;;  %v92_v6 = vld [vmem:[%s3768_s2 + $0xb0] sm:$0xff] }
 0x1ca   :  { %v3207_v17 = vmul.f32 %v985_v12, %v73_v10  ;;  %v809_v18 = vadd.f32 %v2481_v16, %v3183_v0  ;;  %v803_v19 = vpop.f32.mrb[5].mxu1  ;;  %v85_v16 = vld [vmem:[%s3768_s2 + $0x78] sm:$0xff] }
 0x1cb   :  { %v3210_v20 = vmul.f32 %v984_v15, %v72_v13  ;;  %v804_v22 = vadd.f32 %v3183_v0, %v803_v19 }
 0x1cc   :  { %v987_v23 = vmax.f32 %v809_v18, 0.0 }
 0x1cd   :  { %v2726_v25 = vpack.c.bf16 %v3207_v17, %v3210_v20  ;;  %v986_v26 = vmax.f32 %v804_v22, 0.0  ;;  %v2484_v27 = vpop.f32.mrb[6].mxu1  ;;  %v94_v17 = vld [vmem:[%s3768_s2 + $0xc0] sm:$0xff] }
 0x1ce   :  { %v3221_v28 = vmul.f32 %v987_v23, %v75_v21  ;;  %v819_v29 = vadd.f32 %v2484_v27, %v3183_v0  ;;  %v813_v30 = vpop.f32.mrb[7].mxu1  ;;  %v84_v21 = vld [vmem:[%s3768_s2 + $0x70] sm:$0xff] }
 0x1cf   :  { %v3224_v31 = vmul.f32 %v986_v26, %v74_v24  ;;  %v814_v33 = vadd.f32 %v3183_v0, %v813_v30 }
 0x1d0   :  { %v989_v34 = vmax.f32 %v819_v29, 0.0 }
 0x1d1   :  { %v2730_v36 = vpack.c.bf16 %v3221_v28, %v3224_v31  ;;  %v988_v37 = vmax.f32 %v814_v33, 0.0  ;;  %v2487_v38 = vpop.f32.mrb[8].mxu1  ;;  %v96_v28 = vld [vmem:[%s3768_s2 + $0xd0] sm:$0xff] }
 0x1d2   :  { %v3235_v39 = vmul.f32 %v989_v34, %v77_v32  ;;  %v829_v40 = vadd.f32 %v2487_v38, %v3183_v0  ;;  %v823_v41 = vpop.f32.mrb[9].mxu1  ;;  %v87_v32 = vld [vmem:[%s3768_s2 + $0x88] sm:$0xff] }
 0x1d3   :  { %v3238_v42 = vmul.f32 %v988_v37, %v76_v35  ;;  %v824_v44 = vadd.f32 %v3183_v0, %v823_v41  ;;  %v86_v35 = vld [vmem:[%s3768_s2 + $0x80] sm:$0xff] }
 0x1d4   :  { %v991_v45 = vmax.f32 %v829_v40, 0.0 }
 0x1d5   :  { %v2734_v47 = vpack.c.bf16 %v3235_v39, %v3238_v42  ;;  %v990_v48 = vmax.f32 %v824_v44, 0.0  ;;  %v2490_v49 = vpop.f32.mrb[10].mxu1  ;;  %v98_v39 = vld [vmem:[%s3768_s2 + $0xe0] sm:$0xff] }
 0x1d6   :  { %v3249_v50 = vmul.f32 %v991_v45, %v79_v43  ;;  %v839_v51 = vadd.f32 %v2490_v49, %v3183_v0  ;;  %v833_v52 = vpop.f32.mrb[11].mxu1 }
 0x1d7   :  { %v3252_v53 = vmul.f32 %v990_v48, %v78_v46  ;;  %v834_v55 = vadd.f32 %v3183_v0, %v833_v52  ;;  %v89_v46 = vld [vmem:[%s3768_s2 + $0x98] sm:$0xff] }
 0x1d8   :  { %v993_v56 = vmax.f32 %v839_v51, 0.0  ;;  %v88_v51 = vld [vmem:[%s3768_s2 + $0x90] sm:$0xff] }
 0x1d9   :  { %v2738_v58 = vpack.c.bf16 %v3249_v50, %v3252_v53  ;;  %v992_v59 = vmax.f32 %v834_v55, 0.0  ;;  %v2493_v60 = vpop.f32.mrb[12].mxu1  ;;  %v100_v50 = vld [vmem:[%s3768_s2 + $0xf0] sm:$0xff] }
 0x1da   :  { %v3263_v61 = vmul.f32 %v993_v56, %v81_v54  ;;  %v849_v62 = vadd.f32 %v2493_v60, %v3183_v0  ;;  %v843_v63 = vpop.f32.mrb[13].mxu1 }
 0x1db   :  { %v3266_v1 = vmul.f32 %v992_v59, %v80_v57  ;;  %v844_v3 = vadd.f32 %v3183_v0, %v843_v63 }
 0x1dc   :  { %v995_v4 = vmax.f32 %v849_v62, 0.0  ;;  %v91_v62 = vld [vmem:[%s3768_s2 + $0xa8] sm:$0xff] }
 0x1dd   :  { %v2742_v7 = vpack.c.bf16 %v3263_v61, %v3266_v1  ;;  %v994_v8 = vmax.f32 %v844_v3, 0.0  ;;  %v2496_v10 = vpop.f32.mrb[14].mxu1  ;;  %v90_v3 = vld [vmem:[%s3768_s2 + $0xa0] sm:$0xff] }
 0x1de   :  { %v3277_v11 = vmul.f32 %v995_v4, %v83_v2  ;;  %v859_v12 = vadd.f32 %v2496_v10, %v3183_v0  ;;  %v853_v13 = vpop.f32.mrb[15].mxu1  ;;  %v102_v61 = vld [vmem:[%s3768_s2 + $0x100] sm:$0xff] }
 0x1df   :  { %v3280_v15 = vmul.f32 %v994_v8, %v82_v5  ;;  %v854_v18 = vadd.f32 %v3183_v0, %v853_v13 }
 0x1e0   :  { %v997_v19 = vmax.f32 %v859_v12, 0.0 }
 0x1e1   :  { %v2746_v22 = vpack.c.bf16 %v3277_v11, %v3280_v15  ;;  %v996_v23 = vmax.f32 %v854_v18, 0.0  ;;  %v2499_v24 = vpop.f32.mrb[16].mxu1  ;;  %v93_v18 = vld [vmem:[%s3768_s2 + $0xb8] sm:$0xff]  ;;  %v104_v15 = vld [vmem:[%s3768_s2 + $0x110] sm:$0xff] }
 0x1e2   :  { %v3291_v26 = vmul.f32 %v997_v19, %v85_v16  ;;  %v869_v27 = vadd.f32 %v2499_v24, %v3183_v0  ;;  %v863_v29 = vpop.f32.mrb[17].mxu1 }
 0x1e3   :  { %v3294_v30 = vmul.f32 %v996_v23, %v84_v21  ;;  %v864_v33 = vadd.f32 %v3183_v0, %v863_v29 }
 0x1e4   :  { %v999_v34 = vmax.f32 %v869_v27, 0.0 }
 0x1e5   :  { %v2750_v37 = vpack.c.bf16 %v3291_v26, %v3294_v30  ;;  %v998_v38 = vmax.f32 %v864_v33, 0.0  ;;  %v2502_v40 = vpop.f32.mrb[18].mxu1  ;;  %v95_v33 = vld [vmem:[%s3768_s2 + $0xc8] sm:$0xff] }
 0x1e6   :  { %v1039_v41 = vmul.f32 %v999_v34, %v87_v32  ;;  %v879_v43 = vadd.f32 %v2502_v40, %v3183_v0  ;;  %v873_v44 = vpop.f32.mrb[19].mxu1 }
 0x1e7   :  { %v1038_v45 = vmul.f32 %v998_v38, %v86_v35  ;;  %v874_v48 = vadd.f32 %v3183_v0, %v873_v44 }
 0x1e8   :  { %v1001_v49 = vmax.f32 %v879_v43, 0.0 }
 0x1e9   :  { %v1000_v52 = vmax.f32 %v874_v48, 0.0  ;;  %v2505_v54 = vpop.f32.mrb[20].mxu1  ;;  %v2720_v55 = vpack.c.bf16 %v1039_v41, %v1038_v45  ;;  %v97_v45 = vld [vmem:[%s3768_s2 + $0xd8] sm:$0xff] }
 0x1ea   :  { %v1041_v56 = vmul.f32 %v1001_v49, %v89_v46  ;;  %v889_v57 = vadd.f32 %v2505_v54, %v3183_v0  ;;  %v883_v59 = vpop.f32.mrb[21].mxu1 }
 0x1eb   :  { %v1040_v60 = vmul.f32 %v1000_v52, %v88_v51  ;;  %v884_v63 = vadd.f32 %v3183_v0, %v883_v59  ;;  %2721 = vmatprep.subr.bf16.mxu0 %v2720_v55 }
 0x1ec   :  { %v1003_v2 = vmax.f32 %v889_v57, 0.0  ;;  %2723 = vmatpush3.bf16.msra.mxu0 %v2722_v14 }
 0x1ed   :  { %v1002_v4 = vmax.f32 %v884_v63, 0.0  ;;  %v2508_v5 = vpop.f32.mrb[22].mxu1  ;;  %v2724_v8 = vpack.c.bf16 %v1041_v56, %v1040_v60  ;;  %v99_v56 = vld [vmem:[%s3768_s2 + $0xe8] sm:$0xff] }
 0x1ee   :  { %v1043_v10 = vmul.f32 %v1003_v2, %v91_v62  ;;  %v899_v12 = vadd.f32 %v2508_v5, %v3183_v0  ;;  %v893_v13 = vpop.f32.mrb[23].mxu1 }
 0x1ef   :  { %v1042_v16 = vmul.f32 %v1002_v4, %v90_v3  ;;  %v894_v19 = vadd.f32 %v3183_v0, %v893_v13  ;;  %2725 = vmatprep.subr.bf16.mxu0 %v2724_v8  ;;  %v101_v4 = vld [vmem:[%s3768_s2 + $0xf8] sm:$0xff] }
 0x1f0   :  { %v1005_v21 = vmax.f32 %v899_v12, 0.0  ;;  %2727 = vmatpush3.bf16.msra.mxu0 %v2726_v25 }
 0x1f1   :  { %v1004_v9 = vmax.f32 %v894_v19, 0.0  ;;  %v2511_v14 = vpop.f32.mrb[24].mxu1  ;;  %v2728_v23 = vpack.c.bf16 %v1043_v10, %v1042_v16  ;;  %v103_v19 = vld [vmem:[%s3768_s2 + $0x108] sm:$0xff] }
 0x1f2   :  { %v1045_v24 = vmul.f32 %v1005_v21, %v93_v18  ;;  %v909_v27 = vadd.f32 %v2511_v14, %v3183_v0  ;;  %v903_v29 = vpop.f32.mrb[25].mxu1 }
 0x1f3   :  { %v1044_v32 = vmul.f32 %v1004_v9, %v92_v6  ;;  %v904_v34 = vadd.f32 %v3183_v0, %v903_v29  ;;  %2729 = vmatprep.subr.bf16.mxu0 %v2728_v23  ;;  %v105_v29 = vld [vmem:[%s3768_s2 + $0x118] sm:$0xff] }
 0x1f4   :  { %v1007_v35 = vmax.f32 %v909_v27, 0.0  ;;  %2731 = vmatpush3.bf16.msra.mxu0 %v2730_v36 }
 0x1f5   :  { %v1006_v20 = vmax.f32 %v904_v34, 0.0  ;;  %v2514_v25 = vpop.f32.mrb[26].mxu1  ;;  %v2732_v38 = vpack.c.bf16 %v1045_v24, %v1044_v32 }
 0x1f6   :  { %v1047_v40 = vmul.f32 %v1007_v35, %v95_v33  ;;  %v919_v41 = vadd.f32 %v2514_v25, %v3183_v0  ;;  %v913_v43 = vpop.f32.mrb[27].mxu1  ;;  %v107_v25 = vld [vmem:[%s3768_s2 + $0x128] sm:$0xff] }
 0x1f7   :  { %v1046_v44 = vmul.f32 %v1006_v20, %v94_v17  ;;  %v914_v46 = vadd.f32 %v3183_v0, %v913_v43  ;;  %2733 = vmatprep.subr.bf16.mxu0 %v2732_v38  ;;  %v1066_v17 = vld [vmem:[%s3767_s3 + $0x20] sm:$0xff]  ;;  %v1065_v43 = vld [vmem:[%s3767_s3 + $0x18] sm:$0xff] }
 0x1f8   :  { %v1009_v48 = vmax.f32 %v919_v41, 0.0  ;;  %2735 = vmatpush3.bf16.msra.mxu0 %v2734_v47  ;;  %v106_v41 = vld [vmem:[%s3768_s2 + $0x120] sm:$0xff] }
 0x1f9   :  { %v1008_v31 = vmax.f32 %v914_v46, 0.0  ;;  %v2517_v36 = vpop.f32.mrb[28].mxu1  ;;  %v2736_v49 = vpack.c.bf16 %v1047_v40, %v1046_v44 }
 0x1fa   :  { %v1049_v51 = vmul.f32 %v1009_v48, %v97_v45  ;;  %v929_v52 = vadd.f32 %v2517_v36, %v3183_v0  ;;  %v923_v54 = vpop.f32.mrb[29].mxu1  ;;  %v1069_v48 = vld [vmem:[%s3767_s3 + $0x38] sm:$0xff] }
 0x1fb   :  { %v1048_v55 = vmul.f32 %v1008_v31, %v96_v28  ;;  %v924_v57 = vadd.f32 %v3183_v0, %v923_v54  ;;  %2737 = vmatprep.subr.bf16.mxu0 %v2736_v49 }
 0x1fc   :  { %v1011_v59 = vmax.f32 %v929_v52, 0.0  ;;  %2739 = vmatpush3.bf16.msra.mxu0 %v2738_v58 }
 0x1fd   :  { %v1010_v42 = vmax.f32 %v924_v57, 0.0  ;;  %v2520_v47 = vpop.f32.mrb[30].mxu1  ;;  %v2740_v60 = vpack.c.bf16 %v1049_v51, %v1048_v55  ;;  %v109_v51 = vld [vmem:[%s3768_s2 + $0x138] sm:$0xff]  ;;  %v108_v55 = vld [vmem:[%s3768_s2 + $0x130] sm:$0xff] }
 0x1fe   :  { %v1051_v62 = vmul.f32 %v1011_v59, %v99_v56  ;;  %v939_v63 = vadd.f32 %v2520_v47, %v3183_v0  ;;  %v933_v2 = vpop.f32.mrb[31].mxu1  ;;  %v1068_v56 = vld [vmem:[%s3767_s3 + $0x30] sm:$0xff]  ;;  %v135_v47 = vld [vmem:[%s3765_s4 + $0xc8] sm:$0xff] }
 0x1ff   :  { %v1050_v3 = vmul.f32 %v1010_v42, %v98_v39  ;;  %v934_v5 = vadd.f32 %v3183_v0, %v933_v2  ;;  %2741 = vmatprep.subr.bf16.mxu0 %v2740_v60  ;;  %v1072_v59 = vld [vmem:[%s3767_s3 + $0x50] sm:$0xff] }
 0x200   :  { %v1013_v8 = vmax.f32 %v939_v63, 0.0  ;;  %2743 = vmatpush3.bf16.msra.mxu0 %v2742_v7  ;;  %v1075_v63 = vld [vmem:[%s3767_s3 + $0x68] sm:$0xff] }
 0x201   :  { %v1012_v53 = vmax.f32 %v934_v5, 0.0  ;;  %v2523_v58 = vpop.f32.mrb[32].mxu1  ;;  %v2744_v10 = vpack.c.bf16 %v1051_v62, %v1050_v3  ;;  %v1071_v62 = vld [vmem:[%s3767_s3 + $0x48] sm:$0xff]  ;;  %v137_v5 = vld [vmem:[%s3765_s4 + $0xd8] sm:$0xff] }
 0x202   :  { %v1053_v12 = vmul.f32 %v1013_v8, %v101_v4  ;;  %v949_v13 = vadd.f32 %v2523_v58, %v3183_v0  ;;  %v943_v16 = vpop.f32.mrb[33].mxu1  ;;  %v136_v4 = vld [vmem:[%s3765_s4 + $0xd0] sm:$0xff]  ;;  %v1074_v8 = vld [vmem:[%s3767_s3 + $0x60] sm:$0xff] }
 0x203   :  { %v1052_v18 = vmul.f32 %v1012_v53, %v100_v50  ;;  %v944_v21 = vadd.f32 %v3183_v0, %v943_v16  ;;  %2745 = vmatprep.subr.bf16.mxu0 %v2744_v10  ;;  %v1067_v50 = vld [vmem:[%s3767_s3 + $0x28] sm:$0xff]  ;;  %v1078_v53 = vld [vmem:[%s3767_s3 + $0x80] sm:$0xff]  ;;  %v2772_v10 = vpack.c.bf16 %v137_v5, %v136_v4  ;;  %v1081_v16 = vld [vmem:[%s3767_s3 + $0x98] sm:$0xff] }
 0x204   :  { %v1015_v6 = vmax.f32 %v949_v13, 0.0  ;;  %2747 = vmatpush3.bf16.msra.mxu0 %v2746_v22  ;;  %v1062_v22 = vld [vmem:[%s3767_s3] sm:$0xff]  ;;  %v1073_v13 = vld [vmem:[%s3767_s3 + $0x58] sm:$0xff] }
 0x205   :  { %v1014_v1 = vmax.f32 %v944_v21, 0.0  ;;  %v2748_v7 = vpack.c.bf16 %v1053_v12, %v1052_v18  ;;  %v2526_v9 = vpop.f32.mrb[34].mxu1  ;;  %v1070_v58 = vld [vmem:[%s3767_s3 + $0x40] sm:$0xff]  ;;  %v1077_v12 = vld [vmem:[%s3767_s3 + $0x78] sm:$0xff]  ;;  %v1076_v18 = vld [vmem:[%s3767_s3 + $0x70] sm:$0xff] }
 0x206   :  { %v1055_v14 = vmul.f32 %v1015_v6, %v103_v19  ;;  %v959_v23 = vadd.f32 %v2526_v9, %v3183_v0  ;;  %v953_v24 = vpop.f32.mrb[35].mxu1  ;;  %v1080_v19 = vld [vmem:[%s3767_s3 + $0x90] sm:$0xff]  ;;  %v1079_v21 = vld [vmem:[%s3767_s3 + $0x88] sm:$0xff]  ;;  %v130_v5 = vld [vmem:[%s3765_s4 + $0xa0] sm:$0xff] }
 0x207   :  { %v1054_v27 = vmul.f32 %v1014_v1, %v102_v61  ;;  %2749 = vmatprep.subr.bf16.mxu0 %v2748_v7  ;;  %v954_v32 = vadd.f32 %v3183_v0, %v953_v24  ;;  %v1084_v6 = vld [vmem:[%s3767_s3 + $0xb0] sm:$0xff]  ;;  %v1082_v61 = vld [vmem:[%s3767_s3 + $0xa0] sm:$0xff]  ;;  %v1083_v1 = vld [vmem:[%s3767_s3 + $0xa8] sm:$0xff] }
 0x208   :  { %2751 = vmatpush3.bf16.msra.mxu0 %v2750_v37  ;;  %v1017_v11 = vmax.f32 %v959_v23, 0.0  ;;  %v1085_v7 = vld [vmem:[%s3767_s3 + $0xb8] sm:$0xff]  ;;  %v1087_v9 = vld [vmem:[%s3767_s3 + $0xc8] sm:$0xff]  ;;  %v1086_v23 = vld [vmem:[%s3767_s3 + $0xc0] sm:$0xff] }
 0x209   :  { %v2752_v33 = vpack.c.bf16 %v1055_v14, %v1054_v27  ;;  %v1016_v34 = vmax.f32 %v954_v32, 0.0  ;;  %v2529_v35 = vpop.f32.mrb[36].mxu1  ;;  %v1088_v14 = vld [vmem:[%s3767_s3 + $0xd0] sm:$0xff]  ;;  %v1091_v24 = vld [vmem:[%s3767_s3 + $0xe8] sm:$0xff]  ;;  %v1090_v27 = vld [vmem:[%s3767_s3 + $0xe0] sm:$0xff] }
 0x20a   :  { %v1057_v20 = vmul.f32 %v1017_v11, %v105_v29  ;;  %v969_v26 = vadd.f32 %v2529_v35, %v3183_v0  ;;  %v963_v30 = vpop.f32.mrb[37].mxu1  ;;  %v1089_v29 = vld [vmem:[%s3767_s3 + $0xd8] sm:$0xff]  ;;  %v138_v32 = vld [vmem:[%s3765_s4 + $0xe0] sm:$0xff]  ;;  %v139_v11 = vld [vmem:[%s3765_s4 + $0xe8] sm:$0xff] }
 0x20b   :  { %2753 = vmatprep.subr.bf16.mxu1 %v2752_v33  ;;  %v1056_v37 = vmul.f32 %v1016_v34, %v104_v15  ;;  %1187 = vmatmul.mubr.f32.vlgmr.msra.gmra.mrb[40].mxu0 %v1062_v22  ;;  %v964_v38 = vadd.f32 %v3183_v0, %v963_v30  ;;  %v2776_v15 = vpack.c.bf16 %v139_v11, %v138_v32  ;;  %v140_v22 = vld [vmem:[%s3765_s4 + $0xf0] sm:$0xff]  ;;  %v126_v35 = vld [vmem:[%s3765_s4 + $0x80] sm:$0xff]  ;;  %v143_v30 = vld [vmem:[%s3765_s4 + $0x108] sm:$0xff] }
 0x20c   :  { %2755 = vmatpush3.bf16.msra.mxu1 %v2752_v33  ;;  %v1019_v40 = vmax.f32 %v969_v26, 0.0  ;;  %1191 = vmatprep.mubr.f32.mxu0 %v1066_v17  ;;  %v141_v33 = vld [vmem:[%s3765_s4 + $0xf8] sm:$0xff]  ;;  %v127_v17 = vld [vmem:[%s3765_s4 + $0x88] sm:$0xff]  ;;  %v142_v26 = vld [vmem:[%s3765_s4 + $0x100] sm:$0xff] }
 0x20d   :  { %v2756_v44 = vpack.c.bf16 %v1057_v20, %v1056_v37  ;;  %v1018_v45 = vmax.f32 %v964_v38, 0.0  ;;  %v2532_v46 = vpop.f32.mrb[38].mxu1  ;;  %v2780_v34 = vpack.c.bf16 %v141_v33, %v140_v22  ;;  %v2784_v20 = vpack.c.bf16 %v127_v17, %v126_v35  ;;  %v144_v37 = vld [vmem:[%s3765_s4 + $0x110] sm:$0xff]  ;;  %v145_v38 = vld [vmem:[%s3765_s4 + $0x118] sm:$0xff] }
 0x20e   :  { %v1059_v28 = vmul.f32 %v1019_v40, %v107_v25  ;;  %v979_v31 = vadd.f32 %v2532_v46, %v3183_v0  ;;  %v973_v36 = vpop.f32.mrb[39].mxu1  ;;  %v2800_v25 = vpack.c.bf16 %v143_v30, %v142_v26  ;;  %v2804_v40 = vpack.c.bf16 %v145_v38, %v144_v37  ;;  %v3588_v38 = vld [vmem:[%s3769_s0] sm:$0xff] }
 0x20f   :  { %2757 = vmatprep.subr.bf16.mxu1 %v2756_v44  ;;  %v1058_v49 = vmul.f32 %v1018_v45, %v106_v41  ;;  %1192 = vmatmul.mubr.f32.gmra.mrb[42].mxu0 %v1065_v43  ;;  %v974_v52 = vadd.f32 %v3183_v0, %v973_v36  ;;  %v134_v0 = vld [vmem:[%s3765_s4 + $0xc0] sm:$0xff]  ;;  %v147_v43 = vld [vmem:[%s3765_s4 + $0x128] sm:$0xff] }
 0x210   :  { %2759 = vmatpush3.bf16.msra.mxu1 %v2756_v44  ;;  %v1021_v54 = vmax.f32 %v979_v31, 0.0  ;;  %1196 = vmatprep.mubr.f32.mxu0 %v1069_v48  ;;  %v2768_v3 = vpack.c.bf16 %v135_v47, %v134_v0  ;;  %v146_v41 = vld [vmem:[%s3765_s4 + $0x120] sm:$0xff] }
 0x211   :  { %v1020_v57 = vmax.f32 %v974_v52, 0.0  ;;  %v2760_v39 = vpack.c.bf16 %v1059_v28, %v1058_v49  ;;  %2801 = vmatprep.subr.bf16.mxu0 %v2800_v25  ;;  %v2808_v44 = vpack.c.bf16 %v147_v43, %v146_v41  ;;  %v3601_v41 = vld [vmem:[%s3769_s0 + $0x10] sm:$0xff]  ;;  %v3610_v43 = vld [vmem:[%s3769_s0 + $0x18] sm:$0xff] }
 0x212   :  { %v1061_v42 = vmul.f32 %v1021_v54, %v109_v51  ;;  %2803 = vmatpush3.bf16.msra.mxu0 %v2800_v25 }
 0x213   :  { %v1060_v60 = vmul.f32 %v1020_v57, %v108_v55  ;;  %1197 = vmatmul.mubr.f32.gmra.mrb[44].mxu0 %v1068_v56  ;;  %2761 = vmatprep.subr.bf16.mxu1 %v2760_v39 }
 0x214   :  { %1201 = vmatprep.mubr.f32.mxu0 %v1072_v59  ;;  %2763 = vmatpush3.bf16.msra.mxu1 %v2760_v39  ;;  %v128_v39 = vld [vmem:[%s3765_s4 + $0x90] sm:$0xff] }
 0x215   :  { %v2764_v2 = vpack.c.bf16 %v1061_v42, %v1060_v60  ;;  %2805 = vmatprep.subr.bf16.mxu0 %v2804_v40  ;;  %v129_v42 = vld [vmem:[%s3765_s4 + $0x98] sm:$0xff] }
 0x216   :  { %2807 = vmatpush3.bf16.msra.mxu0 %v2804_v40  ;;  %v3596_v40 = vld [vmem:[%s3769_s0 + $0x8] sm:$0xff] }
 0x217   :  { %1202 = vmatmul.mubr.f32.gmra.mrb[46].mxu0 %v1071_v62  ;;  %2765 = vmatprep.subr.bf16.mxu1 %v2764_v2 }
 0x218   :  { %1206 = vmatprep.mubr.f32.mxu0 %v1075_v63  ;;  %2767 = vmatpush3.bf16.msra.mxu1 %v2764_v2  ;;  %v2788_v2 = vpack.c.bf16 %v129_v42, %v128_v39  ;;  %v154_v39 = vld [vmem:[%s3765_s4 + $0x160] sm:$0xff]  ;;  %v155_v42 = vld [vmem:[%s3765_s4 + $0x168] sm:$0xff] }
 0x219   :  { %2769 = vmatprep.subr.bf16.mxu1 %v2768_v3  ;;  %2809 = vmatprep.subr.bf16.mxu0 %v2808_v44 }
 0x21a   :  { %2811 = vmatpush3.bf16.msra.mxu0 %v2808_v44  ;;  %v3615_v44 = vld [vmem:[%s3769_s0 + $0x20] sm:$0xff] }
 0x21b   :  { %1207 = vmatmul.mubr.f32.gmra.mrb[48].mxu0 %v1074_v8  ;;  %2550 = vmatmul.mubr.msk.f32.vlgmr.msra.gmra.mrb[40].mxu1 %vm167_vm0, %v1067_v50  ;;  %v131_v8 = vld [vmem:[%s3765_s4 + $0xa8] sm:$0xff] }
 0x21c   :  { %1211 = vmatprep.mubr.f32.mxu0 %v1078_v53  ;;  %2552 = vmatprep.mubr.msk.f32.mxu1 %vm167_vm0, %v1070_v58 }
 0x21d   :  { %2771 = vmatpush3.bf16.msra.mxu1 %v2768_v3 }
 0x21e   :  { %2773 = vmatprep.subr.bf16.mxu1 %v2772_v10 }
 0x21f   :  { %1212 = vmatmul.mubr.f32.gmra.mrb[50].mxu0 %v1077_v12  ;;  %2553 = vmatmul.mubr.msk.f32.gmra.mrb[42].mxu1 %vm167_vm0, %v1073_v13  ;;  %v2792_v13 = vpack.c.bf16 %v131_v8, %v130_v5 }
 0x220   :  { %1216 = vmatprep.mubr.f32.mxu0 %v1081_v16  ;;  %2555 = vmatprep.mubr.msk.f32.mxu1 %vm167_vm0, %v1076_v18 }
 0x221   :  { %2775 = vmatpush3.bf16.msra.mxu1 %v2772_v10 }
 0x222   :  { %2777 = vmatprep.subr.bf16.mxu1 %v2776_v15 }
 0x223   :  { %1217 = vmatmul.mubr.f32.gmra.mrb[52].mxu0 %v1080_v19  ;;  %2556 = vmatmul.mubr.msk.f32.gmra.mrb[44].mxu1 %vm167_vm0, %v1079_v21  ;;  %v132_v19 = vld [vmem:[%s3765_s4 + $0xb0] sm:$0xff]  ;;  %v133_v21 = vld [vmem:[%s3765_s4 + $0xb8] sm:$0xff] }
 0x224   :  { %1221 = vmatprep.mubr.f32.mxu0 %v1084_v6  ;;  %2558 = vmatprep.mubr.msk.f32.mxu1 %vm167_vm0, %v1082_v61 }
 0x225   :  { %2779 = vmatpush3.bf16.msra.mxu1 %v2776_v15 }
 0x226   :  { %2781 = vmatprep.subr.bf16.mxu1 %v2780_v34 }
 0x227   :  { %1222 = vmatmul.mubr.f32.gmra.mrb[54].mxu0 %v1083_v1  ;;  %2559 = vmatmul.mubr.msk.f32.gmra.mrb[46].mxu1 %vm167_vm0, %v1085_v7 }
 0x228   :  { %1226 = vmatprep.mubr.f32.mxu0 %v1087_v9  ;;  %2561 = vmatprep.mubr.msk.f32.mxu1 %vm167_vm0, %v1088_v14  ;;  %v2796_v14 = vpack.c.bf16 %v133_v21, %v132_v19 }
 0x229   :  { %2783 = vmatpush3.bf16.msra.mxu1 %v2780_v34 }
 0x22a   :  { %2785 = vmatprep.subr.bf16.mxu1 %v2784_v20 }
 0x22b   :  { %1227 = vmatmul.mubr.f32.gmra.mrb[56].mxu0 %v1086_v23  ;;  %2562 = vmatmul.mubr.msk.f32.gmra.mrb[48].mxu1 %vm167_vm0, %v1091_v24 }
 0x22c   :  { %1231 = vmatprep.mubr.f32.mxu0 %v1090_v27 }
 0x22f   :  { %1232 = vmatmul.mubr.f32.gmra.mrb[58].mxu0 %v1089_v29 }
 0x2de   :  { %v2261_v45 = vpop.f32.mrb[40].mxu0 }
 0x2df   :  { %v2262_v46 = vpop.f32.mrb[41].mxu0 }
 0x2e0   :  { %v2263_v48 = vadd.f32 %v2262_v46, %v2261_v45  ;;  %v3624_v45 = vld [vmem:[%s3769_s0 + $0x28] sm:$0xff]  ;;  %v3629_v46 = vld [vmem:[%s3769_s0 + $0x30] sm:$0xff] }
 0x2e2   :  { %v2264_v28 = vpop.f32.mrb[42].mxu0 }
 0x2e3   :  { %v2265_v31 = vpop.f32.mrb[43].mxu0 }
 0x2e4   :  { %v2266_v36 = vadd.f32 %v2265_v31, %v2264_v28  ;;  %v3643_v28 = vld [vmem:[%s3769_s0 + $0x40] sm:$0xff]  ;;  %v3652_v31 = vld [vmem:[%s3769_s0 + $0x48] sm:$0xff] }
 0x2e6   :  { %v2267_v49 = vpop.f32.mrb[44].mxu0 }
 0x2e7   :  { %v2268_v51 = vpop.f32.mrb[45].mxu0 }
 0x2e8   :  { %v2269_v52 = vadd.f32 %v2268_v51, %v2267_v49  ;;  %v149_v49 = vld [vmem:[%s3765_s4 + $0x138] sm:$0xff] }
 0x2ea   :  { %v2270_v54 = vpop.f32.mrb[46].mxu0 }
 0x2eb   :  { %v2271_v55 = vpop.f32.mrb[47].mxu0 }
 0x2ec   :  { %v2272_v56 = vadd.f32 %v2271_v55, %v2270_v54  ;;  %v151_v54 = vld [vmem:[%s3765_s4 + $0x148] sm:$0xff]  ;;  %v152_v55 = vld [vmem:[%s3765_s4 + $0x150] sm:$0xff] }
 0x2ee   :  { %v2551_v57 = vpop.f32.mrb[40].mxu1  ;;  %v2273_v59 = vpop.f32.mrb[48].mxu0 }
 0x2ef   :  { %v1309_v0 = vadd.f32 %v2551_v57, %v2266_v36  ;;  %v1303_v47 = vpop.f32.mrb[41].mxu1  ;;  %v2274_v60 = vpop.f32.mrb[49].mxu0  ;;  %v148_v36 = vld [vmem:[%s3765_s4 + $0x130] sm:$0xff]  ;;  %v153_v57 = vld [vmem:[%s3765_s4 + $0x158] sm:$0xff] }
 0x2f0   :  { %v1304_v62 = vadd.f32 %v2263_v48, %v1303_v47  ;;  %v2275_v63 = vadd.f32 %v2274_v60, %v2273_v59  ;;  %v3638_v48 = vld [vmem:[%s3769_s0 + $0x38] sm:$0xff]  ;;  %v2812_v51 = vpack.c.bf16 %v149_v49, %v148_v36  ;;  %v2820_v59 = vpack.c.bf16 %v153_v57, %v152_v55  ;;  %v2110_v47 = vld [vmem:[%s3765_s4 + $0x182] ss:$0 sm:$0xff] }
 0x2f2   :  { %v2554_v3 = vpop.f32.mrb[42].mxu1  ;;  %2580 = vmatprep.mubr.msk.f32.mxu1 %vm167_vm0, %v1304_v62  ;;  %v2276_v4 = vpop.f32.mrb[50].mxu0  ;;  %2813 = vmatprep.subr.bf16.mxu0 %v2812_v51 }
 0x2f3   :  { %v1319_v50 = vadd.f32 %v2554_v3, %v2272_v56  ;;  %v1313_v53 = vpop.f32.mrb[43].mxu1  ;;  %2581 = vmatmul.mubr.msk.f32.vlgmr.msra.gmra.mrb[50].mxu1 %vm167_vm0, %v1309_v0  ;;  %v2277_v58 = vpop.f32.mrb[51].mxu0  ;;  %2815 = vmatpush3.bf16.msra.mxu0 %v2812_v51  ;;  %v2824_v0 = vpack.c.bf16 %v155_v42, %v154_v39 }
 0x2f4   :  { %v1314_v10 = vadd.f32 %v2269_v52, %v1313_v53  ;;  %v2278_v12 = vadd.f32 %v2277_v58, %v2276_v4  ;;  %2787 = vmatpush3.bf16.msra.mxu1 %v2784_v20  ;;  %v150_v52 = vld [vmem:[%s3765_s4 + $0x140] sm:$0xff] }
 0x2f5   :  { %2789 = vmatprep.subr.bf16.mxu1 %v2788_v2  ;;  %v2816_v56 = vpack.c.bf16 %v151_v54, %v150_v52 }
 0x2f6   :  { %v2557_v16 = vpop.f32.mrb[44].mxu1  ;;  %2583 = vmatprep.mubr.msk.f32.mxu1 %vm167_vm0, %v1314_v10  ;;  %v2279_v18 = vpop.f32.mrb[52].mxu0 }
 0x2f7   :  { %v1329_v6 = vadd.f32 %v2557_v16, %v2278_v12  ;;  %v1323_v61 = vpop.f32.mrb[45].mxu1  ;;  %2584 = vmatmul.mubr.msk.f32.gmra.mrb[52].mxu1 %vm167_vm0, %v1319_v50  ;;  %v2280_v1 = vpop.f32.mrb[53].mxu0  ;;  %2817 = vmatprep.subr.bf16.mxu0 %v2816_v56 }
 0x2f8   :  { %v1324_v7 = vadd.f32 %v2275_v63, %v1323_v61  ;;  %v2281_v9 = vadd.f32 %v2280_v1, %v2279_v18  ;;  %2791 = vmatpush3.bf16.msra.mxu1 %v2788_v2 }
 0x2f9   :  { %2793 = vmatprep.subr.bf16.mxu1 %v2792_v13 }
 0x2fa   :  { %v2282_v23 = vpop.f32.mrb[54].mxu0  ;;  %v2560_v24 = vpop.f32.mrb[46].mxu1  ;;  %2586 = vmatprep.mubr.msk.f32.mxu1 %vm167_vm0, %v1324_v7 }
 0x2fb   :  { %v2283_v27 = vpop.f32.mrb[55].mxu0  ;;  %v1333_v29 = vpop.f32.mrb[47].mxu1  ;;  %2587 = vmatmul.mubr.msk.f32.gmra.mrb[54].mxu1 %vm167_vm0, %v1329_v6 }
 0x2fc   :  { %v2284_v32 = vadd.f32 %v2283_v27, %v2282_v23  ;;  %v1334_v11 = vadd.f32 %v2281_v9, %v1333_v29  ;;  %2795 = vmatpush3.bf16.msra.mxu1 %v2792_v13 }
 0x2fd   :  { %2797 = vmatprep.subr.bf16.mxu1 %v2796_v14 }
 0x2fe   :  { %v1339_v15 = vadd.f32 %v2560_v24, %v2284_v32  ;;  %v2285_v22 = vpop.f32.mrb[56].mxu0  ;;  %v2563_v33 = vpop.f32.mrb[48].mxu1  ;;  %2589 = vmatprep.mubr.msk.f32.mxu1 %vm167_vm0, %v1334_v11 }
 0x2ff   :  { %v2286_v34 = vpop.f32.mrb[57].mxu0  ;;  %v1343_v35 = vpop.f32.mrb[49].mxu1 }
 0x300   :  { %v2287_v17 = vadd.f32 %v2286_v34, %v2285_v22  ;;  %2590 = vmatmul.mubr.msk.f32.gmra.mrb[56].mxu1 %vm167_vm0, %v1339_v15  ;;  %v156_v15 = vld [vmem:[%s3765_s4 + $0x170] sm:$0xff]  ;;  %v157_v22 = vld [vmem:[%s3765_s4 + $0x178] sm:$0xff]  ;;  %v2111_v34 = vld [vmem:[%s3765_s4 + $0x183] ss:$0 sm:$0xff] }
 0x301   :  { %2799 = vmatpush3.bf16.msra.mxu1 %v2796_v14 }
 0x302   :  { %v2288_v20 = vpop.f32.mrb[58].mxu0  ;;  %v1344_v26 = vadd.f32 %v2287_v17, %v1343_v35  ;;  %2832 = vmatprep.subr.bf16.mxu1 %v2816_v56 }
 0x303   :  { %v2289_v30 = vpop.f32.mrb[59].mxu0 }
 0x304   :  { %v2290_v37 = vadd.f32 %v2289_v30, %v2288_v20  ;;  %2592 = vmatprep.mubr.msk.f32.mxu1 %vm167_vm0, %v1344_v26 }
 0x306   :  { %v1349_v25 = vadd.f32 %v2563_v33, %v2290_v37  ;;  %v2828_v33 = vpack.c.bf16 %v157_v22, %v156_v15 }
 0x308   :  { %2593 = vmatmul.mubr.msk.f32.gmra.mrb[58].mxu1 %vm167_vm0, %v1349_v25 }
 0x309   :  { %2611 = vmatprep.mubr.msk.f32.mxu1 %vm167_vm0, %v3588_v38 }
 0x30c   :  { %2612 = vmatmul.mubr.msk.f32.vlgmr.msra.gmra.mrb[50].mxu1 %vm167_vm0, %v3596_v40 }
 0x30d   :  { %2614 = vmatprep.mubr.msk.f32.mxu1 %vm167_vm0, %v3601_v41  ;;  %2836 = vmatpush3.bf16.msra.mxu1 %v2816_v56 }
 0x30e   :  { %2833 = vmatprep.subr.bf16.mxu1 %v2820_v59 }
 0x310   :  { %2615 = vmatmul.mubr.msk.f32.gmra.mrb[52].mxu1 %vm167_vm0, %v3610_v43 }
 0x311   :  { %2617 = vmatprep.mubr.msk.f32.mxu1 %vm167_vm0, %v3615_v44  ;;  %2837 = vmatpush3.bf16.msra.mxu1 %v2820_v59 }
 0x312   :  { %2834 = vmatprep.subr.bf16.mxu1 %v2824_v0 }
 0x314   :  { %2618 = vmatmul.mubr.msk.f32.gmra.mrb[54].mxu1 %vm167_vm0, %v3624_v45 }
 0x315   :  { %2620 = vmatprep.mubr.msk.f32.mxu1 %vm167_vm0, %v3629_v46  ;;  %2838 = vmatpush3.bf16.msra.mxu1 %v2824_v0 }
 0x316   :  { %2835 = vmatprep.subr.bf16.mxu1 %v2828_v33 }
 0x318   :  { %2621 = vmatmul.mubr.msk.f32.gmra.mrb[56].mxu1 %vm167_vm0, %v3638_v48 }
 0x319   :  { %2623 = vmatprep.mubr.msk.f32.mxu1 %vm167_vm0, %v3643_v28  ;;  %2839 = vmatpush3.bf16.msra.mxu1 %v2828_v33 }
 0x31c   :  { %2624 = vmatmul.mubr.msk.f32.gmra.mrb[58].mxu1 %vm167_vm0, %v3652_v31 }
 0x3df   :  { %v2613_v60 = vpop.f32.mrb[50].mxu1 }
 0x3e0   :  { %v1647_v62 = vadd.f32 %v2613_v60, %v2110_v47  ;;  %v1593_v63 = vpop.f32.mrb[51].mxu1 }
 0x3e1   :  { %v1646_v2 = vadd.f32 %v2110_v47, %v1593_v63 }
 0x3e2   :  { %v1657_v5 = vmax.f32 %v1647_v62, 0.0 }
 0x3e3   :  { %v1656_v3 = vmax.f32 %v1646_v2, 0.0  ;;  %v2616_v4 = vpop.f32.mrb[52].mxu1 }
 0x3e4   :  { %v1649_v8 = vadd.f32 %v2616_v4, %v2110_v47  ;;  %v1603_v50 = vpop.f32.mrb[53].mxu1 }
 0x3e5   :  { %2642 = vmatprep.mubr.msk.f32.mxu0 %vm167_vm0, %v1656_v3  ;;  %v1648_v53 = vadd.f32 %v2110_v47, %v1603_v50 }
 0x3e6   :  { %2643 = vmatmul.mubr.msk.f32.vlgmr.msra.gmra.mrb[60].mxu0 %vm167_vm0, %v1657_v5  ;;  %v1659_v12 = vmax.f32 %v1649_v8, 0.0 }
 0x3e7   :  { %v1658_v58 = vmax.f32 %v1648_v53, 0.0  ;;  %v2619_v10 = vpop.f32.mrb[54].mxu1  ;;  %2819 = vmatpush3.bf16.msra.mxu0 %v2816_v56 }
 0x3e8   :  { %v1651_v13 = vadd.f32 %v2619_v10, %v2110_v47  ;;  %v1613_v16 = vpop.f32.mrb[55].mxu1  ;;  %2821 = vmatprep.subr.bf16.mxu0 %v2820_v59 }
 0x3e9   :  { %2645 = vmatprep.mubr.msk.f32.mxu0 %vm167_vm0, %v1658_v58  ;;  %v1650_v18 = vadd.f32 %v2110_v47, %v1613_v16  ;;  %v2122_v58 = vld [vmem:[%s3765_s4 + $0x184] ss:$0 sm:$0xff] }
 0x3ea   :  { %2646 = vmatmul.mubr.msk.f32.gmra.mrb[62].mxu0 %vm167_vm0, %v1659_v12  ;;  %v1661_v6 = vmax.f32 %v1651_v13, 0.0 }
 0x3eb   :  { %v1660_v19 = vmax.f32 %v1650_v18, 0.0  ;;  %v2622_v21 = vpop.f32.mrb[56].mxu1  ;;  %2823 = vmatpush3.bf16.msra.mxu0 %v2820_v59 }
 0x3ec   :  { %v1653_v61 = vadd.f32 %v2622_v21, %v2110_v47  ;;  %v1623_v1 = vpop.f32.mrb[57].mxu1  ;;  %2825 = vmatprep.subr.bf16.mxu0 %v2824_v0 }
 0x3ed   :  { %2648 = vmatprep.mubr.msk.f32.mxu0 %vm167_vm0, %v1660_v19  ;;  %v1652_v7 = vadd.f32 %v2110_v47, %v1623_v1 }
 0x3ee   :  { %2649 = vmatmul.mubr.msk.f32.gmra.mrb[64].mxu0 %vm167_vm0, %v1661_v6  ;;  %v1663_v23 = vmax.f32 %v1653_v61, 0.0 }
 0x3ef   :  { %v1662_v9 = vmax.f32 %v1652_v7, 0.0  ;;  %v2625_v14 = vpop.f32.mrb[58].mxu1  ;;  %2827 = vmatpush3.bf16.msra.mxu0 %v2824_v0 }
 0x3f0   :  { %v1655_v24 = vadd.f32 %v2625_v14, %v2110_v47  ;;  %v1633_v27 = vpop.f32.mrb[59].mxu1  ;;  %2829 = vmatprep.subr.bf16.mxu0 %v2828_v33 }
 0x3f1   :  { %2651 = vmatprep.mubr.msk.f32.mxu0 %vm167_vm0, %v1662_v9  ;;  %v1654_v29 = vadd.f32 %v2110_v47, %v1633_v27 }
 0x3f2   :  { %2652 = vmatmul.mubr.msk.f32.gmra.mrb[66].mxu0 %vm167_vm0, %v1663_v23  ;;  %v1665_v11 = vmax.f32 %v1655_v24, 0.0 }
 0x3f3   :  { %v1664_v32 = vmax.f32 %v1654_v29, 0.0  ;;  %2831 = vmatpush3.bf16.msra.mxu0 %v2828_v33 }
 0x3f5   :  { %2654 = vmatprep.mubr.msk.f32.mxu0 %vm167_vm0, %v1664_v32 }
 0x3f6   :  { %2655 = vmatmul.mubr.msk.f32.gmra.mrb[68].mxu0 %vm167_vm0, %v1665_v11 }
 0x4b9   :  { %v2644_v35 = vpop.f32.mrb[60].mxu0 }
 0x4ba   :  { %v1772_v17 = vadd.f32 %v2644_v35, %v2111_v34  ;;  %v1766_v20 = vpop.f32.mrb[61].mxu0 }
 0x4bb   :  { %v1767_v26 = vadd.f32 %v2111_v34, %v1766_v20 }
 0x4bc   :  { %v1816_v25 = vmax.f32 %v1772_v17, 0.0 }
 0x4bd   :  { %v1815_v30 = vmax.f32 %v1767_v26, 0.0  ;;  %v2647_v37 = vpop.f32.mrb[62].mxu0 }
 0x4be   :  { %v1782_v36 = vadd.f32 %v2647_v37, %v2111_v34  ;;  %v1776_v49 = vpop.f32.mrb[63].mxu0 }
 0x4bf   :  { %2673 = vmatprep.mubr.msk.f32.mxu0 %vm167_vm0, %v1815_v30  ;;  %v1777_v51 = vadd.f32 %v2111_v34, %v1776_v49 }
 0x4c0   :  { %2674 = vmatmul.mubr.msk.f32.vlgmr.msra.gmra.mrb[70].mxu0 %vm167_vm0, %v1816_v25  ;;  %v1818_v55 = vmax.f32 %v1782_v36, 0.0 }
 0x4c1   :  { %v1817_v52 = vmax.f32 %v1777_v51, 0.0  ;;  %v2650_v54 = vpop.f32.mrb[64].mxu0 }
 0x4c2   :  { %v1792_v56 = vadd.f32 %v2650_v54, %v2111_v34  ;;  %v1786_v57 = vpop.f32.mrb[65].mxu0 }
 0x4c3   :  { %2676 = vmatprep.mubr.msk.f32.mxu0 %vm167_vm0, %v1817_v52  ;;  %v1787_v59 = vadd.f32 %v2111_v34, %v1786_v57 }
 0x4c4   :  { %2677 = vmatmul.mubr.msk.f32.gmra.mrb[72].mxu0 %vm167_vm0, %v1818_v55  ;;  %v1820_v0 = vmax.f32 %v1792_v56, 0.0 }
 0x4c5   :  { %v1819_v39 = vmax.f32 %v1787_v59, 0.0  ;;  %v2653_v42 = vpop.f32.mrb[66].mxu0 }
 0x4c6   :  { %v1802_v47 = vadd.f32 %v2653_v42, %v2111_v34  ;;  %v1796_v60 = vpop.f32.mrb[67].mxu0 }
 0x4c7   :  { %2679 = vmatprep.mubr.msk.f32.mxu0 %vm167_vm0, %v1819_v39  ;;  %v1797_v62 = vadd.f32 %v2111_v34, %v1796_v60 }
 0x4c8   :  { %2680 = vmatmul.mubr.msk.f32.gmra.mrb[74].mxu0 %vm167_vm0, %v1820_v0  ;;  %v1822_v3 = vmax.f32 %v1802_v47, 0.0 }
 0x4c9   :  { %v1821_v63 = vmax.f32 %v1797_v62, 0.0  ;;  %v2656_v2 = vpop.f32.mrb[68].mxu0 }
 0x4ca   :  { %v1812_v4 = vadd.f32 %v2656_v2, %v2111_v34  ;;  %v1806_v5 = vpop.f32.mrb[69].mxu0 }
 0x4cb   :  { %2682 = vmatprep.mubr.msk.f32.mxu1 %vm167_vm0, %v1821_v63  ;;  %v1807_v8 = vadd.f32 %v2111_v34, %v1806_v5 }
 0x4cc   :  { %2683 = vmatmul.mubr.msk.f32.vlgmr.msra.gmra.mrb[60].mxu1 %vm167_vm0, %v1822_v3  ;;  %v1824_v53 = vmax.f32 %v1812_v4, 0.0 }
 0x4cd   :  { %v1823_v50 = vmax.f32 %v1807_v8, 0.0 }
 0x4cf   :  { %2685 = vmatprep.mubr.msk.f32.mxu1 %vm167_vm0, %v1823_v50 }
 0x4d0   :  { %2686 = vmatmul.mubr.msk.f32.gmra.mrb[62].mxu1 %vm167_vm0, %v1824_v53 }
 0x593   :  { %v2675_v10 = vpop.f32.mrb[70].mxu0 }
 0x594   :  { %v1931_v12 = vadd.f32 %v2675_v10, %v2122_v58  ;;  %v1925_v13 = vpop.f32.mrb[71].mxu0 }
 0x595   :  { %v1926_v16 = vadd.f32 %v2122_v58, %v1925_v13 }
 0x596   :  { %v1975_v18 = vadd.f32 %v1931_v12, %v3596_v40 }
 0x597   :  { %v1974_v19 = vadd.f32 %v1926_v16, %v3588_v38  ;;  %v2678_v21 = vpop.f32.mrb[72].mxu0 }
 0x598   :  { %1985 = vst.msk [vmem:[%s3770_s5 + $0x8] sm:$0xff] %vm167_vm0, %v1975_v18  ;;  %v1941_v6 = vadd.f32 %v2678_v21, %v2122_v58  ;;  %v1935_v61 = vpop.f32.mrb[73].mxu0 }
 0x599   :  { %1984 = vst.msk [vmem:[%s3770_s5] sm:$0xff] %vm167_vm0, %v1974_v19  ;;  %v1936_v1 = vadd.f32 %v2122_v58, %v1935_v61 }
 0x59a   :  { %v1977_v7 = vadd.f32 %v1941_v6, %v3610_v43 }
 0x59b   :  { %v1976_v40 = vadd.f32 %v1936_v1, %v3601_v41  ;;  %v2681_v9 = vpop.f32.mrb[74].mxu0 }
 0x59c   :  { %1987 = vst.msk [vmem:[%s3770_s5 + $0x18] sm:$0xff] %vm167_vm0, %v1977_v7  ;;  %v1951_v38 = vadd.f32 %v2681_v9, %v2122_v58  ;;  %v1945_v14 = vpop.f32.mrb[75].mxu0 }
 0x59d   :  { %1986 = vst.msk [vmem:[%s3770_s5 + $0x10] sm:$0xff] %vm167_vm0, %v1976_v40  ;;  %v1946_v23 = vadd.f32 %v2122_v58, %v1945_v14 }
 0x59e   :  { %v1979_v24 = vadd.f32 %v1951_v38, %v3624_v45 }
 0x59f   :  { %v1978_v43 = vadd.f32 %v1946_v23, %v3615_v44  ;;  %v2684_v27 = vpop.f32.mrb[60].mxu1 }
 0x5a0   :  { %1989 = vst.msk [vmem:[%s3770_s5 + $0x28] sm:$0xff] %vm167_vm0, %v1979_v24  ;;  %v1961_v41 = vadd.f32 %v2684_v27, %v2122_v58  ;;  %v1955_v29 = vpop.f32.mrb[61].mxu1 }
 0x5a1   :  { %1988 = vst.msk [vmem:[%s3770_s5 + $0x20] sm:$0xff] %vm167_vm0, %v1978_v43  ;;  %v1956_v32 = vadd.f32 %v2122_v58, %v1955_v29 }
 0x5a2   :  { %v1981_v11 = vadd.f32 %v1961_v41, %v3638_v48 }
 0x5a3   :  { %v1980_v45 = vadd.f32 %v1956_v32, %v3629_v46  ;;  %v2687_v15 = vpop.f32.mrb[62].mxu1 }
 0x5a4   :  { %1991 = vst.msk [vmem:[%s3770_s5 + $0x38] sm:$0xff] %vm167_vm0, %v1981_v11  ;;  %v1971_v44 = vadd.f32 %v2687_v15, %v2122_v58  ;;  %v1965_v22 = vpop.f32.mrb[63].mxu1 }
 0x5a5   :  { %1990 = vst.msk [vmem:[%s3770_s5 + $0x30] sm:$0xff] %vm167_vm0, %v1980_v45  ;;  %v1966_v33 = vadd.f32 %v2122_v58, %v1965_v22 }
 0x5a6   :  { %v1983_v34 = vadd.f32 %v1971_v44, %v3652_v31 }
 0x5a7   :  { %v1982_v48 = vadd.f32 %v1966_v33, %v3643_v28 }
 0x5a8   :  { %1993 = vst.msk [vmem:[%s3770_s5 + $0x48] sm:$0xff] %vm167_vm0, %v1983_v34 }
 0x5a9   :  { %1992 = vst.msk [vmem:[%s3770_s5 + $0x40] sm:$0xff] %vm167_vm0, %v1982_v48 }

</bundles_post_ra>
